<compile_context>
chip_gen: v7x
topology: tpu7x:2x2x1
jax: 0.10.0
libtpu: 0.0.40
codegen_flags: <defaults>
</compile_context>

<pallas_src>
import jax
import jax.numpy as jnp
from jax import lax
from jax.experimental import pallas as pl
from jax.experimental.pallas import tpu as pltpu

IN_CH = 32          # in_channels
FC = 128            # filter_channels
K = 5               # kernel_size
PAD = K // 2
LRELU_SLOPE = 0.1
HALO = 16           # zero-halo rows (bf16 sublane-tile aligned)

assert HALO >= PAD, "halo must cover the conv 'same' padding"
assert HALO % 16 == 0, "halo must stay bf16 sublane-tile aligned"


def _leaky_relu(x):
    return jnp.where(x > 0, x, LRELU_SLOPE * x)


def duration_disc_kernel(
        x_ref, md_ref, mrow_ref,
        wx_ref, bx_ref, wd_ref, bd_ref,
        w1_ref, b1_ref, w2_ref, b2_ref, w3_ref, b3_ref, w4_ref, b4_ref,
        wo_ref, bo_ref,
        out_ref, hbuf_ref):
    T = x_ref.shape[1]          # time rows per element (already padded to 16)
    R = 2 * T + HALO            # fused accumulator rows: [branch0 | halo junk | branch1]
    D0 = HALO                   # scratch row where branch-0 (real d) data starts
    D1 = 2 * HALO + T           # scratch row where branch-1 (d_hat) data starts

    x = x_ref[0]                                  # [T, IN_CH] bf16
    md = md_ref[0]                                # [T, 3] f32 : mask | d | d_hat
    m_col = md[:, 0:1]                            # [T, 1]
    m_bc = jnp.broadcast_to(m_col, (T, FC))       # hoisted: reused by every masking site
    m_row = mrow_ref[0]                           # [1, T] lane-dense mask (output epilogue)

    # --- zero the halo bands: conv zero-padding + branch separators.
    #     Re-done every step so correctness holds under any megacore sharding. ---
    zband = jnp.zeros((HALO, 2 * FC), jnp.bfloat16)
    hbuf_ref[pl.ds(0, HALO), pl.ds(0, 2 * FC)] = zband
    hbuf_ref[pl.ds(T + HALO, HALO), pl.ds(0, 2 * FC)] = zband
    hbuf_ref[pl.ds(2 * T + 2 * HALO, HALO), pl.ds(0, 2 * FC)] = zband

    # --- pre_x (1x1 conv, shared) and pre_d (1 channel -> broadcast) -----------
    hx = jnp.dot(x, wx_ref[...], preferred_element_type=jnp.float32) + bx_ref[...]
    hxm = (hx * m_bc).astype(jnp.bfloat16)                                 # [T, FC]
    hdr = ((md[:, 1:2] * wd_ref[...] + bd_ref[...]) * m_bc).astype(jnp.bfloat16)
    hdg = ((md[:, 2:3] * wd_ref[...] + bd_ref[...]) * m_bc).astype(jnp.bfloat16)

    # layer-1 input = cat([pre_x, pre_d], channels), masked, for both branches
    hbuf_ref[pl.ds(D0, T), pl.ds(0, FC)] = hxm
    hbuf_ref[pl.ds(D1, T), pl.ds(0, FC)] = hxm
    hbuf_ref[pl.ds(D0, T), pl.ds(FC, FC)] = hdr
    hbuf_ref[pl.ds(D1, T), pl.ds(FC, FC)] = hdg

    # --- layer 1: cin = 2*FC, 5 single taps (contraction already 256 deep) -----
    acc = jnp.dot(hbuf_ref[pl.ds(HALO - PAD, R), pl.ds(0, 2 * FC)], w1_ref[0],
                  preferred_element_type=jnp.float32)
    for k in range(1, K):
        acc = acc + jnp.dot(hbuf_ref[pl.ds(k + HALO - PAD, R), pl.ds(0, 2 * FC)],
                            w1_ref[k], preferred_element_type=jnp.float32)
    h = _leaky_relu(acc + b1_ref[...])                                     # [R, FC] f32

    # --- layers 2-4: taps paired into 256-deep contractions (3 MXU passes) -----
    for w_ref, b_ref in ((w2_ref, b2_ref), (w3_ref, b3_ref), (w4_ref, b4_ref)):
        a0 = (h[:T] * m_bc).astype(jnp.bfloat16)
        a1 = (h[T + HALO:] * m_bc).astype(jnp.bfloat16)
        hbuf_ref[pl.ds(D0, T), pl.ds(0, FC)] = a0
        hbuf_ref[pl.ds(D1, T), pl.ds(0, FC)] = a1
        # +1-row shifted copies, read back from hbuf (the zero halo row supplies
        # the trailing A[T] = 0), stored at ALIGNED offsets into cols [FC, 2FC).
        a0u = hbuf_ref[pl.ds(D0 + 1, T), pl.ds(0, FC)]
        a1u = hbuf_ref[pl.ds(D1 + 1, T), pl.ds(0, FC)]
        hbuf_ref[pl.ds(D0, T), pl.ds(FC, FC)] = a0u
        hbuf_ref[pl.ds(D1, T), pl.ds(FC, FC)] = a1u

        # taps {0,1} and {2,3}: one 256-deep matmul each; tap 4 stays 128-deep.
        acc = jnp.dot(hbuf_ref[pl.ds(0 + HALO - PAD, R), pl.ds(0, 2 * FC)],
                      w_ref[pl.ds(0, 2 * FC), pl.ds(0, FC)],
                      preferred_element_type=jnp.float32)
        acc = acc + jnp.dot(hbuf_ref[pl.ds(2 + HALO - PAD, R), pl.ds(0, 2 * FC)],
                            w_ref[pl.ds(2 * FC, 2 * FC), pl.ds(0, FC)],
                            preferred_element_type=jnp.float32)
        acc = acc + jnp.dot(hbuf_ref[pl.ds(4 + HALO - PAD, R), pl.ds(0, FC)],
                            w_ref[pl.ds(4 * FC, FC), pl.ds(0, FC)],
                            preferred_element_type=jnp.float32)
        h = _leaky_relu(acc + b_ref[...])                                  # [R, FC] f32

    # --- out: 1x1 conv FC -> 1 on the VPU/XLU, emitted lane-dense ([1, T]) -----
    mw = m_bc * wo_ref[...]                       # mask * out-weights, [T, FC] f32
    bo = bo_ref[...]                              # [1, 1]
    r0 = jnp.sum(jnp.transpose(h[:T] * mw), axis=0, keepdims=True)         # [1, T]
    r1 = jnp.sum(jnp.transpose(h[T + HALO:] * mw), axis=0, keepdims=True)  # [1, T]
    out_ref[0, pl.ds(0, 1), pl.ds(0, T)] = ((r0 + bo) * m_row).astype(out_ref.dtype)
    out_ref[0, pl.ds(1, 1), pl.ds(0, T)] = ((r1 + bo) * m_row).astype(out_ref.dtype)


def duration_discriminator(x_nct, x_mask_n1t, d_n1t, d_hat_n1t, params):
    """Inputs in PyTorch NCT layout; returns (d_d_r, d_d_g) each [B, 1, T]."""
    B, cin, T = x_nct.shape
    assert cin == IN_CH

    # NCT -> BTC (channels-last, lanes = channels); bf16 activations for the MXU.
    x = jnp.transpose(x_nct, (0, 2, 1)).astype(jnp.bfloat16)               # (B, T, 32)
    # mask / d / d_hat packed into one block (kernel lane-slices cols 0/1/2).
    md = jnp.transpose(jnp.concatenate([x_mask_n1t, d_n1t, d_hat_n1t], axis=1),
                       (0, 2, 1)).astype(jnp.float32)                      # (B, T, 3)
    # lane-dense mask (native layout) for the lane-dense output epilogue.
    mrow = x_mask_n1t.astype(jnp.float32)                                  # (B, 1, T)

    # pad time to a multiple of the bf16 sublane tile (16); padded rows have mask 0,
    # equivalent to the conv's zero padding, so the valid region is exact.
    Tp = ((T + HALO - 1) // HALO) * HALO
    assert Tp % HALO == 0
    if Tp != T:
        x = jnp.pad(x, ((0, 0), (0, Tp - T), (0, 0)))
        md = jnp.pad(md, ((0, 0), (0, Tp - T), (0, 0)))
        mrow = jnp.pad(mrow, ((0, 0), (0, 0), (0, Tp - T)))

    p = params
    bf = lambda w: w.astype(jnp.bfloat16)
    # layers 2-4 weights flattened to (K*FC, FC): row blocks [0:2FC) and [2FC:4FC)
    # are exactly the paired-tap weights, [4FC:5FC) is tap 4.
    weights = [bf(p['wx']), p['bx'], p['wd'], p['bd'],
               bf(p['w1']), p['b1'],
               bf(p['w2']).reshape(K * FC, FC), p['b2'],
               bf(p['w3']).reshape(K * FC, FC), p['b3'],
               bf(p['w4']).reshape(K * FC, FC), p['b4'],
               p['wo'].reshape(1, FC), p['bo']]

    def wspec(shape):
        nd = len(shape)
        return pl.BlockSpec(shape, lambda b, _nd=nd: (0,) * _nd)

    in_specs = ([pl.BlockSpec((1, Tp, IN_CH), lambda b: (b, 0, 0)),
                 pl.BlockSpec((1, Tp, 3), lambda b: (b, 0, 0)),
                 pl.BlockSpec((1, 1, Tp), lambda b: (b, 0, 0))]
                + [wspec(w.shape) for w in weights])

    # scheduler hint for XLA around the custom call
    flops = int(2 * B * 2 * Tp * K * FC * (2 * FC + 3 * FC)
                + 2 * B * Tp * (IN_CH * FC + 3 * FC))
    bytes_accessed = int(x.size * 2 + md.size * 4 + mrow.size * 4 + B * 2 * Tp * 4
                         + sum(int(w.size) * w.dtype.itemsize for w in weights))
    cost = pl.CostEstimate(flops=flops, transcendentals=0,
                           bytes_accessed=bytes_accessed)

    # explicit scoped-VMEM budget: hbuf + double-buffered blocks + f32 temporaries.
    # TODO(synk): for very long sequences on v7x (64 MiB VMEM) add a time-chunk
    # loop over the fused accumulator instead of raising the limit further.
    vmem_limit = int(min(128 * 1024 * 1024,
                         max(32 * 1024 * 1024, 10 * 1024 * Tp + 8 * 1024 * 1024)))

    out = pl.pallas_call(
        duration_disc_kernel,
        grid=(B,),
        in_specs=in_specs,
        out_specs=pl.BlockSpec((1, 2, Tp), lambda b: (b, 0, 0)),
        out_shape=jax.ShapeDtypeStruct((B, 2, Tp), jnp.float32),
        scratch_shapes=[pltpu.VMEM((2 * Tp + 3 * HALO, 2 * FC), jnp.bfloat16)],
        compiler_params=pltpu.CompilerParams(
            dimension_semantics=("parallel",),
            vmem_limit_bytes=vmem_limit),
        cost_estimate=cost,
    )(x, md, mrow, *weights)

    # rows [T, Tp) of the lane axis are masked/garbage; slice to the valid region.
    d_d_r = out[:, 0:1, :T]     # [B, 1, T]
    d_d_g = out[:, 1:2, :T]
    return d_d_r, d_d_g


# ------------------------- pure-JAX f32 reference (for checking) -------------
def _reference(x_nct, x_mask_n1t, d_n1t, d_hat_n1t, p):
    x = jnp.transpose(x_nct, (0, 2, 1))
    m = jnp.transpose(x_mask_n1t, (0, 2, 1))
    dr = jnp.transpose(d_n1t, (0, 2, 1))
    dg = jnp.transpose(d_hat_n1t, (0, 2, 1))
    hi = lax.Precision.HIGHEST

    hx = jnp.einsum('btc,cf->btf', x, p['wx'], precision=hi) + p['bx']

    def branch(dur):
        hd = dur * p['wd'] + p['bd']
        h = jnp.concatenate([hx, hd], axis=-1)
        for w, b in ((p['w1'], p['b1']), (p['w2'], p['b2']),
                     (p['w3'], p['b3']), (p['w4'], p['b4'])):
            hm = h * m
            hp = jnp.pad(hm, ((0, 0), (PAD, PAD), (0, 0)))
            T = h.shape[1]
            acc = jnp.zeros((h.shape[0], T, w.shape[2]), jnp.float32) + b
            for k in range(K):
                acc = acc + jnp.einsum('btc,cf->btf', hp[:, k:k + T, :], w[k],
                                       precision=hi)
            h = jnp.where(acc > 0, acc, LRELU_SLOPE * acc)
        o = jnp.einsum('btc,cf->btf', h * m, p['wo'], precision=hi) + p['bo']
        return o * m

    return (jnp.transpose(branch(dr), (0, 2, 1)),
            jnp.transpose(branch(dg), (0, 2, 1)))


# ------------------------------- parameters ----------------------------------
def init_params(key):
    ks = jax.random.split(key, 14)

    def w(k, shape, scale=0.05):
        return (scale * jax.random.normal(k, shape)).astype(jnp.float32)

    # Conv1d weights stored in [K, Cin, Cout] (== PyTorch [Cout, Cin, K] permuted);
    # 1x1 convs stored as [Cin, Cout] matrices; biases as [1, Cout].
    return {
        'wx': w(ks[0], (IN_CH, FC)), 'bx': w(ks[1], (1, FC)),
        'wd': w(ks[2], (1, FC)),     'bd': w(ks[3], (1, FC)),
        'w1': w(ks[4], (K, 2 * FC, FC)), 'b1': w(ks[5], (1, FC)),
        'w2': w(ks[6], (K, FC, FC)),     'b2': w(ks[7], (1, FC)),
        'w3': w(ks[8], (K, FC, FC)),     'b3': w(ks[9], (1, FC)),
        'w4': w(ks[10], (K, FC, FC)),    'b4': w(ks[11], (1, FC)),
        'wo': w(ks[12], (FC, 1)),        'bo': w(ks[13], (1, 1)),
    }


if __name__ == "__main__":
    B, T = 2, 16
    key = jax.random.PRNGKey(0)
    k_p, k_x, k_d, k_g = jax.random.split(key, 4)

    params = init_params(k_p)
    x = jax.random.normal(k_x, (B, IN_CH, T), jnp.float32)
    d = jax.random.normal(k_d, (B, 1, T), jnp.float32)
    d_hat = jax.random.normal(k_g, (B, 1, T), jnp.float32)
    lengths = jnp.array([T, 11])
    x_mask = (jnp.arange(T)[None, None, :] < lengths[:, None, None]).astype(jnp.float32)

    fwd = jax.jit(duration_discriminator)
    d_d_r, d_d_g = fwd(x, x_mask, d, d_hat, params)
    jax.block_until_ready((d_d_r, d_d_g))

    # correctness check vs. pure-JAX f32 reference (kernel runs bf16 on the MXU,
    # f32 accumulation -> loose tolerance)
    ref_r, ref_g = _reference(x, x_mask, d, d_hat, params)
    assert jnp.allclose(d_d_r, ref_r, atol=5e-2, rtol=5e-2), \
        float(jnp.max(jnp.abs(d_d_r - ref_r)))
    assert jnp.allclose(d_d_g, ref_g, atol=5e-2, rtol=5e-2), \
        float(jnp.max(jnp.abs(d_d_g - ref_g)))

    # TODO(synk): torch.masked_select has a data-dependent output shape -> eager
    # JAX boolean gather outside the kernel.
    mask_bool = x_mask.astype(bool)
    d_d_r_sel = d_d_r[mask_bool]
    d_d_g_sel = d_d_g[mask_bool]
    result = ([d_d_r_sel], [d_d_g_sel])
    jax.block_until_ready(result)

    print("KERNEL_OK")
</pallas_src>

<mosaic_0001>
module attributes {stable_mosaic.version = 11 : i64} {
  func.func @duration_disc_kernel(%arg0: i32, %arg1: memref<1x16x32xbf16, #tpu.memory_space<vmem>>, %arg2: memref<1x16x3xf32, #tpu.memory_space<vmem>>, %arg3: memref<1x1x16xf32, #tpu.memory_space<vmem>>, %arg4: memref<32x128xbf16, #tpu.memory_space<vmem>>, %arg5: memref<1x128xf32, #tpu.memory_space<vmem>>, %arg6: memref<1x128xf32, #tpu.memory_space<vmem>>, %arg7: memref<1x128xf32, #tpu.memory_space<vmem>>, %arg8: memref<5x256x128xbf16, #tpu.memory_space<vmem>>, %arg9: memref<1x128xf32, #tpu.memory_space<vmem>>, %arg10: memref<640x128xbf16, #tpu.memory_space<vmem>>, %arg11: memref<1x128xf32, #tpu.memory_space<vmem>>, %arg12: memref<640x128xbf16, #tpu.memory_space<vmem>>, %arg13: memref<1x128xf32, #tpu.memory_space<vmem>>, %arg14: memref<640x128xbf16, #tpu.memory_space<vmem>>, %arg15: memref<1x128xf32, #tpu.memory_space<vmem>>, %arg16: memref<1x128xf32, #tpu.memory_space<vmem>>, %arg17: memref<1x1xf32, #tpu.memory_space<vmem>>, %arg18: memref<1x2x16xf32, #tpu.memory_space<vmem>>, %arg19: memref<80x256xbf16, #tpu.memory_space<vmem>>) attributes {dimension_semantics = [#tpu.dimension_semantics<parallel>], iteration_bounds = array<i64: 2>, scalar_prefetch = 0 : i64, scratch_operands = 1 : i64, tpu.core_type = #tpu.core_type<tc>, window_params = [{transform_indices = @transform_0, window_bounds = array<i64: 1, 16, 32>}, {transform_indices = @transform_1, window_bounds = array<i64: 1, 16, 3>}, {transform_indices = @transform_2, window_bounds = array<i64: 1, 1, 16>}, {pipeline_mode = #tpu.pipeline_mode<synchronous>, transform_indices = @transform_3, window_bounds = array<i64: 32, 128>}, {pipeline_mode = #tpu.pipeline_mode<synchronous>, transform_indices = @transform_4, window_bounds = array<i64: 1, 128>}, {pipeline_mode = #tpu.pipeline_mode<synchronous>, transform_indices = @transform_5, window_bounds = array<i64: 1, 128>}, {pipeline_mode = #tpu.pipeline_mode<synchronous>, transform_indices = @transform_6, window_bounds = array<i64: 1, 128>}, {pipeline_mode = #tpu.pipeline_mode<synchronous>, transform_indices = @transform_7, window_bounds = array<i64: 5, 256, 128>}, {pipeline_mode = #tpu.pipeline_mode<synchronous>, transform_indices = @transform_8, window_bounds = array<i64: 1, 128>}, {pipeline_mode = #tpu.pipeline_mode<synchronous>, transform_indices = @transform_9, window_bounds = array<i64: 640, 128>}, {pipeline_mode = #tpu.pipeline_mode<synchronous>, transform_indices = @transform_10, window_bounds = array<i64: 1, 128>}, {pipeline_mode = #tpu.pipeline_mode<synchronous>, transform_indices = @transform_11, window_bounds = array<i64: 640, 128>}, {pipeline_mode = #tpu.pipeline_mode<synchronous>, transform_indices = @transform_12, window_bounds = array<i64: 1, 128>}, {pipeline_mode = #tpu.pipeline_mode<synchronous>, transform_indices = @transform_13, window_bounds = array<i64: 640, 128>}, {pipeline_mode = #tpu.pipeline_mode<synchronous>, transform_indices = @transform_14, window_bounds = array<i64: 1, 128>}, {pipeline_mode = #tpu.pipeline_mode<synchronous>, transform_indices = @transform_15, window_bounds = array<i64: 1, 128>}, {pipeline_mode = #tpu.pipeline_mode<synchronous>, transform_indices = @transform_16, window_bounds = array<i64: 1, 1>}, {transform_indices = @transform_17, window_bounds = array<i64: 1, 2, 16>}]} {
    %c0 = arith.constant 0 : index
    %c0_0 = arith.constant 0 : index
    %c0_1 = arith.constant 0 : index
    %0 = vector.load %arg1[%c0, %c0_0, %c0_1] : memref<1x16x32xbf16, #tpu.memory_space<vmem>>, vector<1x16x32xbf16>
    %1 = vector.shape_cast %0 : vector<1x16x32xbf16> to vector<16x32xbf16>
    %c0_2 = arith.constant 0 : index
    %c0_3 = arith.constant 0 : index
    %c0_4 = arith.constant 0 : index
    %2 = vector.load %arg2[%c0_2, %c0_3, %c0_4] : memref<1x16x3xf32, #tpu.memory_space<vmem>>, vector<1x16x3xf32>
    %3 = vector.shape_cast %2 : vector<1x16x3xf32> to vector<16x3xf32>
    %4 = vector.extract_strided_slice %3 {offsets = [0, 0], sizes = [16, 1], strides = [1, 1]} : vector<16x3xf32> to vector<16x1xf32>
    %5 = vector.shape_cast %4 : vector<16x1xf32> to vector<16x1xf32>
    %6 = vector.broadcast %5 : vector<16x1xf32> to vector<16x128xf32>
    %c0_5 = arith.constant 0 : index
    %c0_6 = arith.constant 0 : index
    %c0_7 = arith.constant 0 : index
    %7 = vector.load %arg3[%c0_5, %c0_6, %c0_7] : memref<1x1x16xf32, #tpu.memory_space<vmem>>, vector<1x1x16xf32>
    %8 = vector.shape_cast %7 : vector<1x1x16xf32> to vector<1x16xf32>
    %cst = arith.constant 0.000000e+00 : bf16
    %9 = vector.broadcast %cst : bf16 to vector<16x256xbf16>
    %c0_8 = arith.constant 0 : index
    %c0_9 = arith.constant 0 : index
    %10 = vector.load %arg19[%c0_8, %c0_9] : memref<80x256xbf16, #tpu.memory_space<vmem>>, vector<16x256xbf16>
    tpu.vector_store %arg19[%c0_8, %c0_9], %9 {strides = array<i32>} : memref<80x256xbf16, #tpu.memory_space<vmem>>, vector<16x256xbf16>,
    %c32 = arith.constant 32 : index
    %c0_10 = arith.constant 0 : index
    %11 = vector.load %arg19[%c32, %c0_10] : memref<80x256xbf16, #tpu.memory_space<vmem>>, vector<16x256xbf16>
    tpu.vector_store %arg19[%c32, %c0_10], %9 {strides = array<i32>} : memref<80x256xbf16, #tpu.memory_space<vmem>>, vector<16x256xbf16>,
    %c64 = arith.constant 64 : index
    %c0_11 = arith.constant 0 : index
    %12 = vector.load %arg19[%c64, %c0_11] : memref<80x256xbf16, #tpu.memory_space<vmem>>, vector<16x256xbf16>
    tpu.vector_store %arg19[%c64, %c0_11], %9 {strides = array<i32>} : memref<80x256xbf16, #tpu.memory_space<vmem>>, vector<16x256xbf16>,
    %c0_12 = arith.constant 0 : index
    %c0_13 = arith.constant 0 : index
    %13 = vector.load %arg4[%c0_12, %c0_13] : memref<32x128xbf16, #tpu.memory_space<vmem>>, vector<32x128xbf16>
    %cst_14 = arith.constant dense<0.000000e+00> : vector<16x128xf32>
    %14 = tpu.matmul %1, %13, %cst_14 {dimension_numbers = #tpu.dot_dimension_numbers<[1], [0], [0], [1], [0, 0, 1, 1], [], []>} : vector<16x32xbf16>, vector<32x128xbf16>, vector<16x128xf32> -> vector<16x128xf32>
    %c0_15 = arith.constant 0 : index
    %c0_16 = arith.constant 0 : index
    %15 = vector.load %arg5[%c0_15, %c0_16] : memref<1x128xf32, #tpu.memory_space<vmem>>, vector<1x128xf32>
    %16 = vector.broadcast %15 : vector<1x128xf32> to vector<16x128xf32>
    %17 = arith.addf %14, %16 : vector<16x128xf32>
    %18 = arith.mulf %17, %6 : vector<16x128xf32>
    %19 = arith.truncf %18 : vector<16x128xf32> to vector<16x128xbf16>
    %20 = vector.extract_strided_slice %3 {offsets = [0, 1], sizes = [16, 1], strides = [1, 1]} : vector<16x3xf32> to vector<16x1xf32>
    %c0_17 = arith.constant 0 : index
    %c0_18 = arith.constant 0 : index
    %21 = vector.load %arg6[%c0_17, %c0_18] : memref<1x128xf32, #tpu.memory_space<vmem>>, vector<1x128xf32>
    %22 = vector.broadcast %20 : vector<16x1xf32> to vector<16x128xf32>
    %23 = vector.broadcast %21 : vector<1x128xf32> to vector<16x128xf32>
    %24 = arith.mulf %22, %23 : vector<16x128xf32>
    %c0_19 = arith.constant 0 : index
    %c0_20 = arith.constant 0 : index
    %25 = vector.load %arg7[%c0_19, %c0_20] : memref<1x128xf32, #tpu.memory_space<vmem>>, vector<1x128xf32>
    %26 = vector.broadcast %25 : vector<1x128xf32> to vector<16x128xf32>
    %27 = arith.addf %24, %26 : vector<16x128xf32>
    %28 = arith.mulf %27, %6 : vector<16x128xf32>
    %29 = arith.truncf %28 : vector<16x128xf32> to vector<16x128xbf16>
    %30 = vector.extract_strided_slice %3 {offsets = [0, 2], sizes = [16, 1], strides = [1, 1]} : vector<16x3xf32> to vector<16x1xf32>
    %c0_21 = arith.constant 0 : index
    %c0_22 = arith.constant 0 : index
    %31 = vector.load %arg6[%c0_21, %c0_22] : memref<1x128xf32, #tpu.memory_space<vmem>>, vector<1x128xf32>
    %32 = vector.broadcast %30 : vector<16x1xf32> to vector<16x128xf32>
    %33 = vector.broadcast %31 : vector<1x128xf32> to vector<16x128xf32>
    %34 = arith.mulf %32, %33 : vector<16x128xf32>
    %c0_23 = arith.constant 0 : index
    %c0_24 = arith.constant 0 : index
    %35 = vector.load %arg7[%c0_23, %c0_24] : memref<1x128xf32, #tpu.memory_space<vmem>>, vector<1x128xf32>
    %36 = vector.broadcast %35 : vector<1x128xf32> to vector<16x128xf32>
    %37 = arith.addf %34, %36 : vector<16x128xf32>
    %38 = arith.mulf %37, %6 : vector<16x128xf32>
    %39 = arith.truncf %38 : vector<16x128xf32> to vector<16x128xbf16>
    %c16 = arith.constant 16 : index
    %c0_25 = arith.constant 0 : index
    %40 = vector.load %arg19[%c16, %c0_25] : memref<80x256xbf16, #tpu.memory_space<vmem>>, vector<16x128xbf16>
    tpu.vector_store %arg19[%c16, %c0_25], %19 {strides = array<i32>} : memref<80x256xbf16, #tpu.memory_space<vmem>>, vector<16x128xbf16>,
    %c48 = arith.constant 48 : index
    %c0_26 = arith.constant 0 : index
    %41 = vector.load %arg19[%c48, %c0_26] : memref<80x256xbf16, #tpu.memory_space<vmem>>, vector<16x128xbf16>
    tpu.vector_store %arg19[%c48, %c0_26], %19 {strides = array<i32>} : memref<80x256xbf16, #tpu.memory_space<vmem>>, vector<16x128xbf16>,
    %c16_27 = arith.constant 16 : index
    %c128 = arith.constant 128 : index
    %42 = vector.load %arg19[%c16_27, %c128] : memref<80x256xbf16, #tpu.memory_space<vmem>>, vector<16x128xbf16>
    tpu.vector_store %arg19[%c16_27, %c128], %29 {strides = array<i32>} : memref<80x256xbf16, #tpu.memory_space<vmem>>, vector<16x128xbf16>,
    %c48_28 = arith.constant 48 : index
    %c128_29 = arith.constant 128 : index
    %43 = vector.load %arg19[%c48_28, %c128_29] : memref<80x256xbf16, #tpu.memory_space<vmem>>, vector<16x128xbf16>
    tpu.vector_store %arg19[%c48_28, %c128_29], %39 {strides = array<i32>} : memref<80x256xbf16, #tpu.memory_space<vmem>>, vector<16x128xbf16>,
    %c14 = arith.constant 14 : index
    %c0_30 = arith.constant 0 : index
    %44 = vector.load %arg19[%c14, %c0_30] : memref<80x256xbf16, #tpu.memory_space<vmem>>, vector<48x256xbf16>
    %c0_31 = arith.constant 0 : index
    %c0_32 = arith.constant 0 : index
    %c0_33 = arith.constant 0 : index
    %45 = vector.load %arg8[%c0_31, %c0_32, %c0_33] : memref<5x256x128xbf16, #tpu.memory_space<vmem>>, vector<1x256x128xbf16>
    %46 = vector.shape_cast %45 : vector<1x256x128xbf16> to vector<256x128xbf16>
    %cst_34 = arith.constant dense<0.000000e+00> : vector<48x128xf32>
    %47 = tpu.matmul %44, %46, %cst_34 {dimension_numbers = #tpu.dot_dimension_numbers<[1], [0], [0], [1], [0, 0, 1, 1], [], []>} : vector<48x256xbf16>, vector<256x128xbf16>, vector<48x128xf32> -> vector<48x128xf32>
    %c15 = arith.constant 15 : index
    %c0_35 = arith.constant 0 : index
    %48 = vector.load %arg19[%c15, %c0_35] : memref<80x256xbf16, #tpu.memory_space<vmem>>, vector<48x256xbf16>
    %c1 = arith.constant 1 : index
    %c0_36 = arith.constant 0 : index
    %c0_37 = arith.constant 0 : index
    %49 = vector.load %arg8[%c1, %c0_36, %c0_37] : memref<5x256x128xbf16, #tpu.memory_space<vmem>>, vector<1x256x128xbf16>
    %50 = vector.shape_cast %49 : vector<1x256x128xbf16> to vector<256x128xbf16>
    %cst_38 = arith.constant dense<0.000000e+00> : vector<48x128xf32>
    %51 = tpu.matmul %48, %50, %cst_38 {dimension_numbers = #tpu.dot_dimension_numbers<[1], [0], [0], [1], [0, 0, 1, 1], [], []>} : vector<48x256xbf16>, vector<256x128xbf16>, vector<48x128xf32> -> vector<48x128xf32>
    %52 = arith.addf %47, %51 : vector<48x128xf32>
    %c16_39 = arith.constant 16 : index
    %c0_40 = arith.constant 0 : index
    %53 = vector.load %arg19[%c16_39, %c0_40] : memref<80x256xbf16, #tpu.memory_space<vmem>>, vector<48x256xbf16>
    %c2 = arith.constant 2 : index
    %c0_41 = arith.constant 0 : index
    %c0_42 = arith.constant 0 : index
    %54 = vector.load %arg8[%c2, %c0_41, %c0_42] : memref<5x256x128xbf16, #tpu.memory_space<vmem>>, vector<1x256x128xbf16>
    %55 = vector.shape_cast %54 : vector<1x256x128xbf16> to vector<256x128xbf16>
    %cst_43 = arith.constant dense<0.000000e+00> : vector<48x128xf32>
    %56 = tpu.matmul %53, %55, %cst_43 {dimension_numbers = #tpu.dot_dimension_numbers<[1], [0], [0], [1], [0, 0, 1, 1], [], []>} : vector<48x256xbf16>, vector<256x128xbf16>, vector<48x128xf32> -> vector<48x128xf32>
    %57 = arith.addf %52, %56 : vector<48x128xf32>
    %c17 = arith.constant 17 : index
    %c0_44 = arith.constant 0 : index
    %58 = vector.load %arg19[%c17, %c0_44] : memref<80x256xbf16, #tpu.memory_space<vmem>>, vector<48x256xbf16>
    %c3 = arith.constant 3 : index
    %c0_45 = arith.constant 0 : index
    %c0_46 = arith.constant 0 : index
    %59 = vector.load %arg8[%c3, %c0_45, %c0_46] : memref<5x256x128xbf16, #tpu.memory_space<vmem>>, vector<1x256x128xbf16>
    %60 = vector.shape_cast %59 : vector<1x256x128xbf16> to vector<256x128xbf16>
    %cst_47 = arith.constant dense<0.000000e+00> : vector<48x128xf32>
    %61 = tpu.matmul %58, %60, %cst_47 {dimension_numbers = #tpu.dot_dimension_numbers<[1], [0], [0], [1], [0, 0, 1, 1], [], []>} : vector<48x256xbf16>, vector<256x128xbf16>, vector<48x128xf32> -> vector<48x128xf32>
    %62 = arith.addf %57, %61 : vector<48x128xf32>
    %c18 = arith.constant 18 : index
    %c0_48 = arith.constant 0 : index
    %63 = vector.load %arg19[%c18, %c0_48] : memref<80x256xbf16, #tpu.memory_space<vmem>>, vector<48x256xbf16>
    %c4 = arith.constant 4 : index
    %c0_49 = arith.constant 0 : index
    %c0_50 = arith.constant 0 : index
    %64 = vector.load %arg8[%c4, %c0_49, %c0_50] : memref<5x256x128xbf16, #tpu.memory_space<vmem>>, vector<1x256x128xbf16>
    %65 = vector.shape_cast %64 : vector<1x256x128xbf16> to vector<256x128xbf16>
    %cst_51 = arith.constant dense<0.000000e+00> : vector<48x128xf32>
    %66 = tpu.matmul %63, %65, %cst_51 {dimension_numbers = #tpu.dot_dimension_numbers<[1], [0], [0], [1], [0, 0, 1, 1], [], []>} : vector<48x256xbf16>, vector<256x128xbf16>, vector<48x128xf32> -> vector<48x128xf32>
    %67 = arith.addf %62, %66 : vector<48x128xf32>
    %c0_52 = arith.constant 0 : index
    %c0_53 = arith.constant 0 : index
    %68 = vector.load %arg9[%c0_52, %c0_53] : memref<1x128xf32, #tpu.memory_space<vmem>>, vector<1x128xf32>
    %69 = vector.broadcast %68 : vector<1x128xf32> to vector<48x128xf32>
    %70 = arith.addf %67, %69 : vector<48x128xf32>
    %cst_54 = arith.constant 0.000000e+00 : f32
    %71 = vector.broadcast %cst_54 : f32 to vector<48x128xf32>
    %72 = arith.cmpf ogt, %70, %71 : vector<48x128xf32>
    %cst_55 = arith.constant 1.000000e-01 : f32
    %73 = vector.broadcast %cst_55 : f32 to vector<48x128xf32>
    %74 = arith.mulf %73, %70 : vector<48x128xf32>
    %75 = arith.select %72, %70, %74 : vector<48x128xi1>, vector<48x128xf32>
    %76 = vector.extract_strided_slice %75 {offsets = [0, 0], sizes = [16, 128], strides = [1, 1]} : vector<48x128xf32> to vector<16x128xf32>
    %77 = arith.mulf %76, %6 : vector<16x128xf32>
    %78 = arith.truncf %77 : vector<16x128xf32> to vector<16x128xbf16>
    %79 = vector.extract_strided_slice %75 {offsets = [32, 0], sizes = [16, 128], strides = [1, 1]} : vector<48x128xf32> to vector<16x128xf32>
    %80 = arith.mulf %79, %6 : vector<16x128xf32>
    %81 = arith.truncf %80 : vector<16x128xf32> to vector<16x128xbf16>
    %c16_56 = arith.constant 16 : index
    %c0_57 = arith.constant 0 : index
    %82 = vector.load %arg19[%c16_56, %c0_57] : memref<80x256xbf16, #tpu.memory_space<vmem>>, vector<16x128xbf16>
    tpu.vector_store %arg19[%c16_56, %c0_57], %78 {strides = array<i32>} : memref<80x256xbf16, #tpu.memory_space<vmem>>, vector<16x128xbf16>,
    %c48_58 = arith.constant 48 : index
    %c0_59 = arith.constant 0 : index
    %83 = vector.load %arg19[%c48_58, %c0_59] : memref<80x256xbf16, #tpu.memory_space<vmem>>, vector<16x128xbf16>
    tpu.vector_store %arg19[%c48_58, %c0_59], %81 {strides = array<i32>} : memref<80x256xbf16, #tpu.memory_space<vmem>>, vector<16x128xbf16>,
    %c17_60 = arith.constant 17 : index
    %c0_61 = arith.constant 0 : index
    %84 = vector.load %arg19[%c17_60, %c0_61] : memref<80x256xbf16, #tpu.memory_space<vmem>>, vector<16x128xbf16>
    %c49 = arith.constant 49 : index
    %c0_62 = arith.constant 0 : index
    %85 = vector.load %arg19[%c49, %c0_62] : memref<80x256xbf16, #tpu.memory_space<vmem>>, vector<16x128xbf16>
    %c16_63 = arith.constant 16 : index
    %c128_64 = arith.constant 128 : index
    %86 = vector.load %arg19[%c16_63, %c128_64] : memref<80x256xbf16, #tpu.memory_space<vmem>>, vector<16x128xbf16>
    tpu.vector_store %arg19[%c16_63, %c128_64], %84 {strides = array<i32>} : memref<80x256xbf16, #tpu.memory_space<vmem>>, vector<16x128xbf16>,
    %c48_65 = arith.constant 48 : index
    %c128_66 = arith.constant 128 : index
    %87 = vector.load %arg19[%c48_65, %c128_66] : memref<80x256xbf16, #tpu.memory_space<vmem>>, vector<16x128xbf16>
    tpu.vector_store %arg19[%c48_65, %c128_66], %85 {strides = array<i32>} : memref<80x256xbf16, #tpu.memory_space<vmem>>, vector<16x128xbf16>,
    %c14_67 = arith.constant 14 : index
    %c0_68 = arith.constant 0 : index
    %88 = vector.load %arg19[%c14_67, %c0_68] : memref<80x256xbf16, #tpu.memory_space<vmem>>, vector<48x256xbf16>
    %c0_69 = arith.constant 0 : index
    %c0_70 = arith.constant 0 : index
    %89 = vector.load %arg10[%c0_69, %c0_70] : memref<640x128xbf16, #tpu.memory_space<vmem>>, vector<256x128xbf16>
    %cst_71 = arith.constant dense<0.000000e+00> : vector<48x128xf32>
    %90 = tpu.matmul %88, %89, %cst_71 {dimension_numbers = #tpu.dot_dimension_numbers<[1], [0], [0], [1], [0, 0, 1, 1], [], []>} : vector<48x256xbf16>, vector<256x128xbf16>, vector<48x128xf32> -> vector<48x128xf32>
    %c16_72 = arith.constant 16 : index
    %c0_73 = arith.constant 0 : index
    %91 = vector.load %arg19[%c16_72, %c0_73] : memref<80x256xbf16, #tpu.memory_space<vmem>>, vector<48x256xbf16>
    %c256 = arith.constant 256 : index
    %c0_74 = arith.constant 0 : index
    %92 = vector.load %arg10[%c256, %c0_74] : memref<640x128xbf16, #tpu.memory_space<vmem>>, vector<256x128xbf16>
    %cst_75 = arith.constant dense<0.000000e+00> : vector<48x128xf32>
    %93 = tpu.matmul %91, %92, %cst_75 {dimension_numbers = #tpu.dot_dimension_numbers<[1], [0], [0], [1], [0, 0, 1, 1], [], []>} : vector<48x256xbf16>, vector<256x128xbf16>, vector<48x128xf32> -> vector<48x128xf32>
    %94 = arith.addf %90, %93 : vector<48x128xf32>
    %c18_76 = arith.constant 18 : index
    %c0_77 = arith.constant 0 : index
    %95 = vector.load %arg19[%c18_76, %c0_77] : memref<80x256xbf16, #tpu.memory_space<vmem>>, vector<48x128xbf16>
    %c512 = arith.constant 512 : index
    %c0_78 = arith.constant 0 : index
    %96 = vector.load %arg10[%c512, %c0_78] : memref<640x128xbf16, #tpu.memory_space<vmem>>, vector<128x128xbf16>
    %cst_79 = arith.constant dense<0.000000e+00> : vector<48x128xf32>
    %97 = tpu.matmul %95, %96, %cst_79 {dimension_numbers = #tpu.dot_dimension_numbers<[1], [0], [0], [1], [0, 0, 1, 1], [], []>} : vector<48x128xbf16>, vector<128x128xbf16>, vector<48x128xf32> -> vector<48x128xf32>
    %98 = arith.addf %94, %97 : vector<48x128xf32>
    %c0_80 = arith.constant 0 : index
    %c0_81 = arith.constant 0 : index
    %99 = vector.load %arg11[%c0_80, %c0_81] : memref<1x128xf32, #tpu.memory_space<vmem>>, vector<1x128xf32>
    %100 = vector.broadcast %99 : vector<1x128xf32> to vector<48x128xf32>
    %101 = arith.addf %98, %100 : vector<48x128xf32>
    %cst_82 = arith.constant 0.000000e+00 : f32
    %102 = vector.broadcast %cst_82 : f32 to vector<48x128xf32>
    %103 = arith.cmpf ogt, %101, %102 : vector<48x128xf32>
    %cst_83 = arith.constant 1.000000e-01 : f32
    %104 = vector.broadcast %cst_83 : f32 to vector<48x128xf32>
    %105 = arith.mulf %104, %101 : vector<48x128xf32>
    %106 = arith.select %103, %101, %105 : vector<48x128xi1>, vector<48x128xf32>
    %107 = vector.extract_strided_slice %106 {offsets = [0, 0], sizes = [16, 128], strides = [1, 1]} : vector<48x128xf32> to vector<16x128xf32>
    %108 = arith.mulf %107, %6 : vector<16x128xf32>
    %109 = arith.truncf %108 : vector<16x128xf32> to vector<16x128xbf16>
    %110 = vector.extract_strided_slice %106 {offsets = [32, 0], sizes = [16, 128], strides = [1, 1]} : vector<48x128xf32> to vector<16x128xf32>
    %111 = arith.mulf %110, %6 : vector<16x128xf32>
    %112 = arith.truncf %111 : vector<16x128xf32> to vector<16x128xbf16>
    %c16_84 = arith.constant 16 : index
    %c0_85 = arith.constant 0 : index
    %113 = vector.load %arg19[%c16_84, %c0_85] : memref<80x256xbf16, #tpu.memory_space<vmem>>, vector<16x128xbf16>
    tpu.vector_store %arg19[%c16_84, %c0_85], %109 {strides = array<i32>} : memref<80x256xbf16, #tpu.memory_space<vmem>>, vector<16x128xbf16>,
    %c48_86 = arith.constant 48 : index
    %c0_87 = arith.constant 0 : index
    %114 = vector.load %arg19[%c48_86, %c0_87] : memref<80x256xbf16, #tpu.memory_space<vmem>>, vector<16x128xbf16>
    tpu.vector_store %arg19[%c48_86, %c0_87], %112 {strides = array<i32>} : memref<80x256xbf16, #tpu.memory_space<vmem>>, vector<16x128xbf16>,
    %c17_88 = arith.constant 17 : index
    %c0_89 = arith.constant 0 : index
    %115 = vector.load %arg19[%c17_88, %c0_89] : memref<80x256xbf16, #tpu.memory_space<vmem>>, vector<16x128xbf16>
    %c49_90 = arith.constant 49 : index
    %c0_91 = arith.constant 0 : index
    %116 = vector.load %arg19[%c49_90, %c0_91] : memref<80x256xbf16, #tpu.memory_space<vmem>>, vector<16x128xbf16>
    %c16_92 = arith.constant 16 : index
    %c128_93 = arith.constant 128 : index
    %117 = vector.load %arg19[%c16_92, %c128_93] : memref<80x256xbf16, #tpu.memory_space<vmem>>, vector<16x128xbf16>
    tpu.vector_store %arg19[%c16_92, %c128_93], %115 {strides = array<i32>} : memref<80x256xbf16, #tpu.memory_space<vmem>>, vector<16x128xbf16>,
    %c48_94 = arith.constant 48 : index
    %c128_95 = arith.constant 128 : index
    %118 = vector.load %arg19[%c48_94, %c128_95] : memref<80x256xbf16, #tpu.memory_space<vmem>>, vector<16x128xbf16>
    tpu.vector_store %arg19[%c48_94, %c128_95], %116 {strides = array<i32>} : memref<80x256xbf16, #tpu.memory_space<vmem>>, vector<16x128xbf16>,
    %c14_96 = arith.constant 14 : index
    %c0_97 = arith.constant 0 : index
    %119 = vector.load %arg19[%c14_96, %c0_97] : memref<80x256xbf16, #tpu.memory_space<vmem>>, vector<48x256xbf16>
    %c0_98 = arith.constant 0 : index
    %c0_99 = arith.constant 0 : index
    %120 = vector.load %arg12[%c0_98, %c0_99] : memref<640x128xbf16, #tpu.memory_space<vmem>>, vector<256x128xbf16>
    %cst_100 = arith.constant dense<0.000000e+00> : vector<48x128xf32>
    %121 = tpu.matmul %119, %120, %cst_100 {dimension_numbers = #tpu.dot_dimension_numbers<[1], [0], [0], [1], [0, 0, 1, 1], [], []>} : vector<48x256xbf16>, vector<256x128xbf16>, vector<48x128xf32> -> vector<48x128xf32>
    %c16_101 = arith.constant 16 : index
    %c0_102 = arith.constant 0 : index
    %122 = vector.load %arg19[%c16_101, %c0_102] : memref<80x256xbf16, #tpu.memory_space<vmem>>, vector<48x256xbf16>
    %c256_103 = arith.constant 256 : index
    %c0_104 = arith.constant 0 : index
    %123 = vector.load %arg12[%c256_103, %c0_104] : memref<640x128xbf16, #tpu.memory_space<vmem>>, vector<256x128xbf16>
    %cst_105 = arith.constant dense<0.000000e+00> : vector<48x128xf32>
    %124 = tpu.matmul %122, %123, %cst_105 {dimension_numbers = #tpu.dot_dimension_numbers<[1], [0], [0], [1], [0, 0, 1, 1], [], []>} : vector<48x256xbf16>, vector<256x128xbf16>, vector<48x128xf32> -> vector<48x128xf32>
    %125 = arith.addf %121, %124 : vector<48x128xf32>
    %c18_106 = arith.constant 18 : index
    %c0_107 = arith.constant 0 : index
    %126 = vector.load %arg19[%c18_106, %c0_107] : memref<80x256xbf16, #tpu.memory_space<vmem>>, vector<48x128xbf16>
    %c512_108 = arith.constant 512 : index
    %c0_109 = arith.constant 0 : index
    %127 = vector.load %arg12[%c512_108, %c0_109] : memref<640x128xbf16, #tpu.memory_space<vmem>>, vector<128x128xbf16>
    %cst_110 = arith.constant dense<0.000000e+00> : vector<48x128xf32>
    %128 = tpu.matmul %126, %127, %cst_110 {dimension_numbers = #tpu.dot_dimension_numbers<[1], [0], [0], [1], [0, 0, 1, 1], [], []>} : vector<48x128xbf16>, vector<128x128xbf16>, vector<48x128xf32> -> vector<48x128xf32>
    %129 = arith.addf %125, %128 : vector<48x128xf32>
    %c0_111 = arith.constant 0 : index
    %c0_112 = arith.constant 0 : index
    %130 = vector.load %arg13[%c0_111, %c0_112] : memref<1x128xf32, #tpu.memory_space<vmem>>, vector<1x128xf32>
    %131 = vector.broadcast %130 : vector<1x128xf32> to vector<48x128xf32>
    %132 = arith.addf %129, %131 : vector<48x128xf32>
    %cst_113 = arith.constant 0.000000e+00 : f32
    %133 = vector.broadcast %cst_113 : f32 to vector<48x128xf32>
    %134 = arith.cmpf ogt, %132, %133 : vector<48x128xf32>
    %cst_114 = arith.constant 1.000000e-01 : f32
    %135 = vector.broadcast %cst_114 : f32 to vector<48x128xf32>
    %136 = arith.mulf %135, %132 : vector<48x128xf32>
    %137 = arith.select %134, %132, %136 : vector<48x128xi1>, vector<48x128xf32>
    %138 = vector.extract_strided_slice %137 {offsets = [0, 0], sizes = [16, 128], strides = [1, 1]} : vector<48x128xf32> to vector<16x128xf32>
    %139 = arith.mulf %138, %6 : vector<16x128xf32>
    %140 = arith.truncf %139 : vector<16x128xf32> to vector<16x128xbf16>
    %141 = vector.extract_strided_slice %137 {offsets = [32, 0], sizes = [16, 128], strides = [1, 1]} : vector<48x128xf32> to vector<16x128xf32>
    %142 = arith.mulf %141, %6 : vector<16x128xf32>
    %143 = arith.truncf %142 : vector<16x128xf32> to vector<16x128xbf16>
    %c16_115 = arith.constant 16 : index
    %c0_116 = arith.constant 0 : index
    %144 = vector.load %arg19[%c16_115, %c0_116] : memref<80x256xbf16, #tpu.memory_space<vmem>>, vector<16x128xbf16>
    tpu.vector_store %arg19[%c16_115, %c0_116], %140 {strides = array<i32>} : memref<80x256xbf16, #tpu.memory_space<vmem>>, vector<16x128xbf16>,
    %c48_117 = arith.constant 48 : index
    %c0_118 = arith.constant 0 : index
    %145 = vector.load %arg19[%c48_117, %c0_118] : memref<80x256xbf16, #tpu.memory_space<vmem>>, vector<16x128xbf16>
    tpu.vector_store %arg19[%c48_117, %c0_118], %143 {strides = array<i32>} : memref<80x256xbf16, #tpu.memory_space<vmem>>, vector<16x128xbf16>,
    %c17_119 = arith.constant 17 : index
    %c0_120 = arith.constant 0 : index
    %146 = vector.load %arg19[%c17_119, %c0_120] : memref<80x256xbf16, #tpu.memory_space<vmem>>, vector<16x128xbf16>
    %c49_121 = arith.constant 49 : index
    %c0_122 = arith.constant 0 : index
    %147 = vector.load %arg19[%c49_121, %c0_122] : memref<80x256xbf16, #tpu.memory_space<vmem>>, vector<16x128xbf16>
    %c16_123 = arith.constant 16 : index
    %c128_124 = arith.constant 128 : index
    %148 = vector.load %arg19[%c16_123, %c128_124] : memref<80x256xbf16, #tpu.memory_space<vmem>>, vector<16x128xbf16>
    tpu.vector_store %arg19[%c16_123, %c128_124], %146 {strides = array<i32>} : memref<80x256xbf16, #tpu.memory_space<vmem>>, vector<16x128xbf16>,
    %c48_125 = arith.constant 48 : index
    %c128_126 = arith.constant 128 : index
    %149 = vector.load %arg19[%c48_125, %c128_126] : memref<80x256xbf16, #tpu.memory_space<vmem>>, vector<16x128xbf16>
    tpu.vector_store %arg19[%c48_125, %c128_126], %147 {strides = array<i32>} : memref<80x256xbf16, #tpu.memory_space<vmem>>, vector<16x128xbf16>,
    %c14_127 = arith.constant 14 : index
    %c0_128 = arith.constant 0 : index
    %150 = vector.load %arg19[%c14_127, %c0_128] : memref<80x256xbf16, #tpu.memory_space<vmem>>, vector<48x256xbf16>
    %c0_129 = arith.constant 0 : index
    %c0_130 = arith.constant 0 : index
    %151 = vector.load %arg14[%c0_129, %c0_130] : memref<640x128xbf16, #tpu.memory_space<vmem>>, vector<256x128xbf16>
    %cst_131 = arith.constant dense<0.000000e+00> : vector<48x128xf32>
    %152 = tpu.matmul %150, %151, %cst_131 {dimension_numbers = #tpu.dot_dimension_numbers<[1], [0], [0], [1], [0, 0, 1, 1], [], []>} : vector<48x256xbf16>, vector<256x128xbf16>, vector<48x128xf32> -> vector<48x128xf32>
    %c16_132 = arith.constant 16 : index
    %c0_133 = arith.constant 0 : index
    %153 = vector.load %arg19[%c16_132, %c0_133] : memref<80x256xbf16, #tpu.memory_space<vmem>>, vector<48x256xbf16>
    %c256_134 = arith.constant 256 : index
    %c0_135 = arith.constant 0 : index
    %154 = vector.load %arg14[%c256_134, %c0_135] : memref<640x128xbf16, #tpu.memory_space<vmem>>, vector<256x128xbf16>
    %cst_136 = arith.constant dense<0.000000e+00> : vector<48x128xf32>
    %155 = tpu.matmul %153, %154, %cst_136 {dimension_numbers = #tpu.dot_dimension_numbers<[1], [0], [0], [1], [0, 0, 1, 1], [], []>} : vector<48x256xbf16>, vector<256x128xbf16>, vector<48x128xf32> -> vector<48x128xf32>
    %156 = arith.addf %152, %155 : vector<48x128xf32>
    %c18_137 = arith.constant 18 : index
    %c0_138 = arith.constant 0 : index
    %157 = vector.load %arg19[%c18_137, %c0_138] : memref<80x256xbf16, #tpu.memory_space<vmem>>, vector<48x128xbf16>
    %c512_139 = arith.constant 512 : index
    %c0_140 = arith.constant 0 : index
    %158 = vector.load %arg14[%c512_139, %c0_140] : memref<640x128xbf16, #tpu.memory_space<vmem>>, vector<128x128xbf16>
    %cst_141 = arith.constant dense<0.000000e+00> : vector<48x128xf32>
    %159 = tpu.matmul %157, %158, %cst_141 {dimension_numbers = #tpu.dot_dimension_numbers<[1], [0], [0], [1], [0, 0, 1, 1], [], []>} : vector<48x128xbf16>, vector<128x128xbf16>, vector<48x128xf32> -> vector<48x128xf32>
    %160 = arith.addf %156, %159 : vector<48x128xf32>
    %c0_142 = arith.constant 0 : index
    %c0_143 = arith.constant 0 : index
    %161 = vector.load %arg15[%c0_142, %c0_143] : memref<1x128xf32, #tpu.memory_space<vmem>>, vector<1x128xf32>
    %162 = vector.broadcast %161 : vector<1x128xf32> to vector<48x128xf32>
    %163 = arith.addf %160, %162 : vector<48x128xf32>
    %cst_144 = arith.constant 0.000000e+00 : f32
    %164 = vector.broadcast %cst_144 : f32 to vector<48x128xf32>
    %165 = arith.cmpf ogt, %163, %164 : vector<48x128xf32>
    %cst_145 = arith.constant 1.000000e-01 : f32
    %166 = vector.broadcast %cst_145 : f32 to vector<48x128xf32>
    %167 = arith.mulf %166, %163 : vector<48x128xf32>
    %168 = arith.select %165, %163, %167 : vector<48x128xi1>, vector<48x128xf32>
    %c0_146 = arith.constant 0 : index
    %c0_147 = arith.constant 0 : index
    %169 = vector.load %arg16[%c0_146, %c0_147] : memref<1x128xf32, #tpu.memory_space<vmem>>, vector<1x128xf32>
    %170 = vector.broadcast %169 : vector<1x128xf32> to vector<16x128xf32>
    %171 = arith.mulf %6, %170 : vector<16x128xf32>
    %c0_148 = arith.constant 0 : index
    %c0_149 = arith.constant 0 : index
    %172 = vector.load %arg17[%c0_148, %c0_149] : memref<1x1xf32, #tpu.memory_space<vmem>>, vector<1x1xf32>
    %173 = vector.extract_strided_slice %168 {offsets = [0, 0], sizes = [16, 128], strides = [1, 1]} : vector<48x128xf32> to vector<16x128xf32>
    %174 = arith.mulf %173, %171 : vector<16x128xf32>
    %175 = tpu.transpose %174, [1, 0] : vector<16x128xf32> -> vector<128x16xf32>
    %cst_150 = arith.constant dense<0.000000e+00> : vector<16xf32>
    %176 = vector.multi_reduction <add>, %175, %cst_150 [0] : vector<128x16xf32> to vector<16xf32>
    %177 = vector.shape_cast %176 : vector<16xf32> to vector<1x16xf32>
    %178 = vector.extract_strided_slice %168 {offsets = [32, 0], sizes = [16, 128], strides = [1, 1]} : vector<48x128xf32> to vector<16x128xf32>
    %179 = arith.mulf %178, %171 : vector<16x128xf32>
    %180 = tpu.transpose %179, [1, 0] : vector<16x128xf32> -> vector<128x16xf32>
    %cst_151 = arith.constant dense<0.000000e+00> : vector<16xf32>
    %181 = vector.multi_reduction <add>, %180, %cst_151 [0] : vector<128x16xf32> to vector<16xf32>
    %182 = vector.shape_cast %181 : vector<16xf32> to vector<1x16xf32>
    %183 = vector.broadcast %172 : vector<1x1xf32> to vector<1x16xf32>
    %184 = arith.addf %177, %183 : vector<1x16xf32>
    %185 = arith.mulf %184, %8 : vector<1x16xf32>
    %c0_152 = arith.constant 0 : index
    %c0_153 = arith.constant 0 : index
    %c0_154 = arith.constant 0 : index
    %186 = vector.load %arg18[%c0_152, %c0_153, %c0_154] : memref<1x2x16xf32, #tpu.memory_space<vmem>>, vector<1x1x16xf32>
    %187 = vector.shape_cast %186 : vector<1x1x16xf32> to vector<1x16xf32>
    %188 = vector.shape_cast %185 : vector<1x16xf32> to vector<1x1x16xf32>
    tpu.vector_store %arg18[%c0_152, %c0_153, %c0_154], %188 {strides = array<i32>} : memref<1x2x16xf32, #tpu.memory_space<vmem>>, vector<1x1x16xf32>,
    %189 = vector.broadcast %172 : vector<1x1xf32> to vector<1x16xf32>
    %190 = arith.addf %182, %189 : vector<1x16xf32>
    %191 = arith.mulf %190, %8 : vector<1x16xf32>
    %c0_155 = arith.constant 0 : index
    %c1_156 = arith.constant 1 : index
    %c0_157 = arith.constant 0 : index
    %192 = vector.load %arg18[%c0_155, %c1_156, %c0_157] : memref<1x2x16xf32, #tpu.memory_space<vmem>>, vector<1x1x16xf32>
    %193 = vector.shape_cast %192 : vector<1x1x16xf32> to vector<1x16xf32>
    %194 = vector.shape_cast %191 : vector<1x16xf32> to vector<1x1x16xf32>
    tpu.vector_store %arg18[%c0_155, %c1_156, %c0_157], %194 {strides = array<i32>} : memref<1x2x16xf32, #tpu.memory_space<vmem>>, vector<1x1x16xf32>,
    return
  }
  func.func @transform_0(%arg0: i32) -> (i32, i32, i32) {
    %c0_i32 = arith.constant 0 : i32
    %c0_i32_0 = arith.constant 0 : i32
    %c0_i32_1 = arith.constant 0 : i32
    return %arg0, %c0_i32, %c0_i32_0 : i32, i32, i32
  }
  func.func @transform_1(%arg0: i32) -> (i32, i32, i32) {
    %c0_i32 = arith.constant 0 : i32
    %c0_i32_0 = arith.constant 0 : i32
    %c0_i32_1 = arith.constant 0 : i32
    return %arg0, %c0_i32, %c0_i32_0 : i32, i32, i32
  }
  func.func @transform_2(%arg0: i32) -> (i32, i32, i32) {
    %c0_i32 = arith.constant 0 : i32
    %c0_i32_0 = arith.constant 0 : i32
    %c0_i32_1 = arith.constant 0 : i32
    return %arg0, %c0_i32, %c0_i32_0 : i32, i32, i32
  }
  func.func @transform_3(%arg0: i32) -> (i32, i32) {
    %c0_i32 = arith.constant 0 : i32
    %c0_i32_0 = arith.constant 0 : i32
    %c0_i32_1 = arith.constant 0 : i32
    return %c0_i32, %c0_i32_0 : i32, i32
  }
  func.func @transform_4(%arg0: i32) -> (i32, i32) {
    %c0_i32 = arith.constant 0 : i32
    %c0_i32_0 = arith.constant 0 : i32
    %c0_i32_1 = arith.constant 0 : i32
    return %c0_i32, %c0_i32_0 : i32, i32
  }
  func.func @transform_5(%arg0: i32) -> (i32, i32) {
    %c0_i32 = arith.constant 0 : i32
    %c0_i32_0 = arith.constant 0 : i32
    %c0_i32_1 = arith.constant 0 : i32
    return %c0_i32, %c0_i32_0 : i32, i32
  }
  func.func @transform_6(%arg0: i32) -> (i32, i32) {
    %c0_i32 = arith.constant 0 : i32
    %c0_i32_0 = arith.constant 0 : i32
    %c0_i32_1 = arith.constant 0 : i32
    return %c0_i32, %c0_i32_0 : i32, i32
  }
  func.func @transform_7(%arg0: i32) -> (i32, i32, i32) {
    %c0_i32 = arith.constant 0 : i32
    %c0_i32_0 = arith.constant 0 : i32
    %c0_i32_1 = arith.constant 0 : i32
    %c0_i32_2 = arith.constant 0 : i32
    return %c0_i32, %c0_i32_0, %c0_i32_1 : i32, i32, i32
  }
  func.func @transform_8(%arg0: i32) -> (i32, i32) {
    %c0_i32 = arith.constant 0 : i32
    %c0_i32_0 = arith.constant 0 : i32
    %c0_i32_1 = arith.constant 0 : i32
    return %c0_i32, %c0_i32_0 : i32, i32
  }
  func.func @transform_9(%arg0: i32) -> (i32, i32) {
    %c0_i32 = arith.constant 0 : i32
    %c0_i32_0 = arith.constant 0 : i32
    %c0_i32_1 = arith.constant 0 : i32
    return %c0_i32, %c0_i32_0 : i32, i32
  }
  func.func @transform_10(%arg0: i32) -> (i32, i32) {
    %c0_i32 = arith.constant 0 : i32
    %c0_i32_0 = arith.constant 0 : i32
    %c0_i32_1 = arith.constant 0 : i32
    return %c0_i32, %c0_i32_0 : i32, i32
  }
  func.func @transform_11(%arg0: i32) -> (i32, i32) {
    %c0_i32 = arith.constant 0 : i32
    %c0_i32_0 = arith.constant 0 : i32
    %c0_i32_1 = arith.constant 0 : i32
    return %c0_i32, %c0_i32_0 : i32, i32
  }
  func.func @transform_12(%arg0: i32) -> (i32, i32) {
    %c0_i32 = arith.constant 0 : i32
    %c0_i32_0 = arith.constant 0 : i32
    %c0_i32_1 = arith.constant 0 : i32
    return %c0_i32, %c0_i32_0 : i32, i32
  }
  func.func @transform_13(%arg0: i32) -> (i32, i32) {
    %c0_i32 = arith.constant 0 : i32
    %c0_i32_0 = arith.constant 0 : i32
    %c0_i32_1 = arith.constant 0 : i32
    return %c0_i32, %c0_i32_0 : i32, i32
  }
  func.func @transform_14(%arg0: i32) -> (i32, i32) {
    %c0_i32 = arith.constant 0 : i32
    %c0_i32_0 = arith.constant 0 : i32
    %c0_i32_1 = arith.constant 0 : i32
    return %c0_i32, %c0_i32_0 : i32, i32
  }
  func.func @transform_15(%arg0: i32) -> (i32, i32) {
    %c0_i32 = arith.constant 0 : i32
    %c0_i32_0 = arith.constant 0 : i32
    %c0_i32_1 = arith.constant 0 : i32
    return %c0_i32, %c0_i32_0 : i32, i32
  }
  func.func @transform_16(%arg0: i32) -> (i32, i32) {
    %c0_i32 = arith.constant 0 : i32
    %c0_i32_0 = arith.constant 0 : i32
    %c0_i32_1 = arith.constant 0 : i32
    return %c0_i32, %c0_i32_0 : i32, i32
  }
  func.func @transform_17(%arg0: i32) -> (i32, i32, i32) {
    %c0_i32 = arith.constant 0 : i32
    %c0_i32_0 = arith.constant 0 : i32
    %c0_i32_1 = arith.constant 0 : i32
    return %arg0, %c0_i32, %c0_i32_0 : i32, i32, i32
  }
}

</mosaic_0001>

<bundles_post_ra>
// kernel: duration_discriminator.1
= control target key start
LH: loop header
LB: loop body
LE: loop exit
PB: predicated region body
PF: predicated region fallthrough
CT: control target
= control target key end

     0   :  { %s5139_s26 = smov 0   ;;  %s6064_s0 = inlined_call_operand.vmem [shape: bf16[2,16,32], index: 0, kind: input, shape index: {}]   ;;  %s6065_s1 = inlined_call_operand.vmem [shape: f32[2,16,3], index: 1, kind: input, shape index: {}]   ;;  %s6066_s2 = inlined_call_operand.vmem [shape: f32[2,1,16], index: 2, kind: input, shape index: {}]   ;;  %s6067_s3 = inlined_call_operand.vmem [shape: bf16[32,128], index: 3, kind: input, shape index: {}]   ;;  %s6068_s4 = inlined_call_operand.vmem [shape: f32[1,128], index: 4, kind: input, shape index: {}]   ;;  %s6069_s5 = inlined_call_operand.vmem [shape: f32[1,128], index: 5, kind: input, shape index: {}]   ;;  %s6070_s6 = inlined_call_operand.vmem [shape: f32[1,128], index: 6, kind: input, shape index: {}]   ;;  %s6071_s7 = inlined_call_operand.vmem [shape: bf16[5,256,128], index: 7, kind: input, shape index: {}]   ;;  %s6072_s8 = inlined_call_operand.vmem [shape: f32[1,128], index: 8, kind: input, shape index: {}]   ;;  %s6073_s9 = inlined_call_operand.vmem [shape: bf16[640,128], index: 9, kind: input, shape index: {}]   ;;  %s6074_s10 = inlined_call_operand.vmem [shape: f32[1,128], index: 10, kind: input, shape index: {}]   ;;  %s6075_s11 = inlined_call_operand.vmem [shape: bf16[640,128], index: 11, kind: input, shape index: {}]   ;;  %s6076_s12 = inlined_call_operand.vmem [shape: f32[1,128], index: 12, kind: input, shape index: {}]   ;;  %s6077_s13 = inlined_call_operand.vmem [shape: bf16[640,128], index: 13, kind: input, shape index: {}]   ;;  %s6078_s14 = inlined_call_operand.vmem [shape: f32[1,128], index: 14, kind: input, shape index: {}]   ;;  %s6079_s15 = inlined_call_operand.vmem [shape: f32[1,128], index: 15, kind: input, shape index: {}]   ;;  %s6080_s16 = inlined_call_operand.<no memory space> [shape: f32[1,1], index: 16, kind: input, shape index: {}]   ;;  %s6081_s17 = inlined_call_operand.vmem [shape: f32[2,2,16], index: 17, kind: output, shape index: {}]  }
   0x1   :  { %6082 = sst [smem:[#allocation4_spill]] %s6064_s0  ;;  %v22_v0 = vstv %s6080_s16 }
   0x2   :  { %6083 = sst [smem:[#allocation5_spill]] %s6065_s1  ;;  %23 = vst [vmem:[#allocation3] sm:$0x1] %v22_v0 }
   0x3 LB: > { %s3954_s27 = sadd.s32 4294967295, %s5039_s26   ;;  %p3958_p0 = scmp.ge.s32.totalorder %s5039_s26, 1  ;;  %s5039_s26 = sphi %s5139_s26, %s29_s26  }
   0x4   : > { %p507_p1 = scmp.lt.s32.totalorder %s5039_s26, 3 }
   0x6   : > { %p508_p2 = pnand %p3958_p0, %p507_p1 }
   0x7   : > { %v4828_v1 = vld [vmem:[%s6067_s3] sm:$0xff] (!%p508_p2)   ;;  %v5041_v2 = vmov (!%p508_p2), 0.0   ;;  %v4829_v3 = vld [vmem:[%s6067_s3 + $0x8] sm:$0xff] (!%p508_p2)   ;;  %vm5042_vm0 = vmmov (!%p508_p2), 0   ;;  %p566_p3 = scmp.lt.s32.totalorder (!%p508_p2), %s3954_s27, 1  ;;  %v5043_v4 = vmov (!%p508_p2), 1  }
   0x8   : > { %511 = sbr.rel (%p508_p2) target bundleno = 1581 (0x62d), region = 88  ;;  %4718 = vmatprep.subr.bf16.mxu0 (!%p508_p2), %v5041_v2  ;;  %4722 = vmatprep.mubr.msk.bf16.mxu0 (!%p508_p2), %vm5042_vm0, %v5041_v2  ;;  %v5044_v5 = vmov (!%p508_p2), 0   ;;  %vm633_vm1 = vcmask (!%p508_p2), 261120   ;;  %s6084_s20 = sld [smem:[#allocation4_spill]] (!%p508_p2)  ;;  %v4831_v9 = vld [vmem:[%s6071_s7 + $0x40] sm:$0xff] (!%p508_p2)   ;;  %v5045_v11 = vmov (!%p508_p2), 2  }
   0x9   : > { %4719 = vmatpush3.bf16.msra.mxu0 (!%p508_p2), %v4828_v1  ;;  %4823 = vset.pattern.permute.xlu0 (!%p508_p2), %v5043_v4  ;;  %599 = vst [vmem:[#allocation2] sm:$0xff] (!%p508_p2), %v5044_v5  ;;  %600 = vst [vmem:[#allocation2 + $0x8] sm:$0xff] (!%p508_p2), %v5044_v5  ;;  %s6085_s24 = sld [smem:[#allocation5_spill]] (!%p508_p2)  ;;  %v4832_v10 = vld [vmem:[%s6071_s7] sm:$0xff] (!%p508_p2)   ;;  %v4834_v13 = vld [vmem:[%s6071_s7 + $0x48] sm:$0xff] (!%p508_p2)   ;;  %vm1026_vm2 = vcmask (!%p508_p2), 1040384  }
   0xa   : > { %4720 = vmatprep.subr.bf16.mxu0 (!%p508_p2), %v5041_v2  ;;  %601 = vst [vmem:[#allocation2 + $0x20] sm:$0xff] (!%p508_p2), %v5044_v5  ;;  %603 = vst [vmem:[#allocation2 + $0x40] sm:$0xff] (!%p508_p2), %v5044_v5  ;;  %4824 = vset.pattern.permute.xlu1 (!%p508_p2), %v5044_v5  ;;  %v4833_v12 = vld [vmem:[%s6071_s7 + $0xc0] sm:$0xff] (!%p508_p2)   ;;  %v4836_v15 = vld [vmem:[%s6071_s7 + $0x8] sm:$0xff] (!%p508_p2)   ;;  %vm804_vm3 = vsmask.f32 (!%p508_p2), 256 }
   0xb   : > { %604 = vst [vmem:[#allocation2 + $0x48] sm:$0xff] (!%p508_p2), %v5044_v5  ;;  %v4835_v14 = vld [vmem:[%s6071_s7 + $0x80] sm:$0xff] (!%p508_p2)   ;;  %4311 = vmatprep.subr.bf16.mxu1 (!%p508_p2), %v4833_v12  ;;  %v4837_v16 = vld [vmem:[%s6071_s7 + $0xc8] sm:$0xff] (!%p508_p2)   ;;  %v4838_v17 = vld [vmem:[%s6071_s7 + $0x50] sm:$0xff] (!%p508_p2)   ;;  %vm1427_vm4 = vsmask.f32 (!%p508_p2), 7424 }
   0xc   : > { %4312 = vmatpush3.bf16.msra.mxu1 (!%p508_p2), %v4835_v14  ;;  %v4839_v18 = vld [vmem:[%s6071_s7 + $0x88] sm:$0xff] (!%p508_p2)   ;;  %v4840_v19 = vld [vmem:[%s6071_s7 + $0x10] sm:$0xff] (!%p508_p2)   ;;  %v4842_v21 = vld [vmem:[%s6071_s7 + $0x58] sm:$0xff] (!%p508_p2)   ;;  %vm1688_vm5 = vcmask (!%p508_p2), 1046528  }
   0xd   : > { %4721 = vmatpush3.bf16.msra.mxu0 (!%p508_p2), %v4829_v3  ;;  %v4841_v20 = vld [vmem:[%s6071_s7 + $0xd0] sm:$0xff] (!%p508_p2)   ;;  %4313 = vmatprep.subr.bf16.mxu1 (!%p508_p2), %v4837_v16  ;;  %v4844_v23 = vld [vmem:[%s6071_s7 + $0x18] sm:$0xff] (!%p508_p2)   ;;  %v4846_v25 = vld [vmem:[%s6071_s7 + $0x60] sm:$0xff] (!%p508_p2)  }
   0xe   : > { %4345 = vmatprep.subr.bf16.mxu0 (!%p508_p2), %v4831_v9  ;;  %v4843_v22 = vld [vmem:[%s6071_s7 + $0x90] sm:$0xff] (!%p508_p2)   ;;  %v4845_v24 = vld [vmem:[%s6071_s7 + $0xd8] sm:$0xff] (!%p508_p2)   ;;  %v4848_v27 = vld [vmem:[%s6071_s7 + $0x20] sm:$0xff] (!%p508_p2)  }
   0xf   : > { %s6087_s27 = smov (!%p566_p3, %s3954_s27), 1  ;;  %v4847_v26 = vld [vmem:[%s6071_s7 + $0x98] sm:$0xff]   ;;  %v4849_v28 = vld [vmem:[%s6071_s7 + $0xe0] sm:$0xff]   ;;  %v4850_v29 = vld [vmem:[%s6071_s7 + $0x68] sm:$0xff]  }
  0x10   : > { %s4306_s30 = sshll.u32 %s6087_s27, 3  ;;  %s4307_s18 = sshll.u32 %s6087_s27, 4  ;;  %4314 = vmatpush3.bf16.msra.mxu1 %v4839_v18  ;;  %v4851_v30 = vld [vmem:[%s6071_s7 + $0xa0] sm:$0xff]   ;;  %v4852_v31 = vld [vmem:[%s6071_s7 + $0x28] sm:$0xff]   ;;  %v4854_v33 = vld [vmem:[%s6071_s7 + $0x70] sm:$0xff]  }
  0x11   : > { %s570_s21 = scalar_lea.vmem %s6084_s20, %s4306_s30  ;;  %s575_s25 = scalar_lea.vmem %s6085_s24, %s4307_s18  ;;  %4315 = vmatprep.subr.bf16.mxu1 %v4841_v20  ;;  %v4853_v32 = vld [vmem:[%s6071_s7 + $0xe8] sm:$0xff]   ;;  %v4856_v35 = vld [vmem:[%s6071_s7 + $0x30] sm:$0xff]   ;;  %v4858_v37 = vld [vmem:[%s6071_s7 + $0x78] sm:$0xff]  }
  0x12   : > { %v4830_v6 = vld [vmem:[%s570_s21] sm:$0xff]   ;;  %v587_v8 = vld [vmem:[%s575_s25 + $0x8] sm:$0xff]  ;;  %v4857_v36 = vld [vmem:[%s6071_s7 + $0xf0] sm:$0xff]   ;;  %s578_s24 = scalar_lea.vmem %s6066_s2, %s6087_s27 }
  0x13   : > { %v586_v7 = vld [vmem:[%s575_s25] sm:$0xff]  ;;  %4723 = vmatmul.mubr.msk.bf16.vlgmr.msra.gmra.mrb[0].mxu0 %vm633_vm1, %v4830_v6  ;;  %v4855_v34 = vld [vmem:[%s6071_s7 + $0xa8] sm:$0xff]   ;;  %v4859_v38 = vld [vmem:[%s6071_s7 + $0xb0] sm:$0xff]   ;;  %s3963_s25 = sshll.u32 %s6087_s27, 1 }
  0x14   : > { %590 = vperm.xlu1 %4824, %v586_v7   ;;  %683 = vperm.xlu0 %4823, %v586_v7   ;;  %v4860_v39 = vld [vmem:[%s6071_s7 + $0x38] sm:$0xff]   ;;  %v4862_v41 = vld [vmem:[%s6071_s7 + $0x1c0] sm:$0xff]   ;;  %v730_v49 = vld [vmem:[#allocation2 + $0x8] sm:$0x80]  ;;  %s582_s16 = scalar_lea.vmem %s6081_s17, %s3963_s25 }
  0x15   : > { %4346 = vmatpush3.bf16.msra.mxu0 %v4832_v10  ;;  %4316 = vmatpush3.bf16.msra.mxu1 %v4843_v22  ;;  %v4861_v40 = vld [vmem:[%s6071_s7 + $0xf8] sm:$0xff]   ;;  %v4865_v43 = vld [vmem:[%s6071_s7 + $0x140] sm:$0xff]   ;;  %v818_v54 = vshrl.u32 %v730_v49, 16  ;;  %v1030_v61 = vrot.slane %v730_v49, 7  ;;  %v4869_v49 = vld [vmem:[%s6071_s7 + $0x148] sm:$0xff]  }
  0x16   : > { %4347 = vmatprep.subr.bf16.mxu0 %v4834_v13  ;;  %4317 = vmatprep.subr.bf16.mxu1 %v4845_v24  ;;  %v4863_v42 = vld [vmem:[%s6071_s7 + $0xb8] sm:$0xff]   ;;  %v3969_v44 = vld [vmem:[%s6069_s5] ss:$0 sm:$0xff] }
  0x17   : > { %v3970_v45 = vld [vmem:[%s6070_s6] ss:$0 sm:$0xff]  ;;  %v820_v63 = vrot.slane %v818_v54, 7 }
  0x18   : > { %595 = vperm.xlu1 %4824, %v587_v8   ;;  %687 = vperm.xlu0 %4823, %v587_v8   ;;  %v3964_v16 = vld [vmem:[%s6068_s4] ss:$0 sm:$0xff] }
  0x19   : > { %4348 = vmatpush3.bf16.msra.mxu0 %v4836_v15  ;;  %4318 = vmatpush3.bf16.msra.mxu1 %v4847_v26  ;;  %v5301_v26 = vld [vmem:[#allocation2] sm:$0xff] }
  0x1a   : > { %4349 = vmatprep.subr.bf16.mxu0 %v4838_v17  ;;  %4319 = vmatprep.subr.bf16.mxu1 %v4849_v28 }
  0x1c   : > { %4826 = vset.pattern.permute.xlu1 %v5045_v11  ;;  %4825 = vset.pattern.permute.xlu0 %v5045_v11 }
  0x1d   : > { %715 = vperm.xlu1 %4826, %v587_v8   ;;  %711 = vperm.xlu0 %4825, %v586_v7  }
  0x1e   : > { %4350 = vmatpush3.bf16.msra.mxu0 %v4840_v19  ;;  %4320 = vmatpush3.bf16.msra.mxu1 %v4851_v30 }
  0x1f   : > { %4351 = vmatprep.subr.bf16.mxu0 %v4842_v21  ;;  %4321 = vmatprep.subr.bf16.mxu1 %v4853_v32 }
  0x22   : > { %4352 = vmatpush3.bf16.msra.mxu0 %v4844_v23  ;;  %4322 = vmatpush3.bf16.msra.mxu1 %v4855_v34  ;;  %v729_v23 = vld [vmem:[#allocation2] sm:$0x80] }
  0x23   : > { %4353 = vmatprep.subr.bf16.mxu0 %v4846_v25  ;;  %4323 = vmatprep.subr.bf16.mxu1 %v4857_v36  ;;  %v806_v30 = vshrl.u32 %v729_v23, 16  ;;  %v4866_v36 = vld [vmem:[%s6071_s7 + $0x1c8] sm:$0xff]  }
  0x26   : > { %4354 = vmatpush3.bf16.msra.mxu0 %v4848_v27  ;;  %4324 = vmatpush3.bf16.msra.mxu1 %v4859_v38  ;;  %v838_v27 = vshrl.u32 %v5301_v26, 16 }
  0x27   : > { %4355 = vmatprep.subr.bf16.mxu0 %v4850_v29  ;;  %4325 = vmatprep.subr.bf16.mxu1 %v4861_v40  ;;  %v1027_v29 = vrot.slane %v729_v23, 7 }
  0x2a   : > { %4356 = vmatpush3.bf16.msra.mxu0 %v4852_v31  ;;  %4326 = vmatpush3.bf16.msra.mxu1 %v4863_v42  ;;  %v5307_v31 = vrot.slane %v5301_v26, 7 }
  0x2b   : > { %4357 = vmatprep.subr.bf16.mxu0 %v4854_v33  ;;  %4379 = vmatprep.subr.bf16.mxu1 %v4865_v43  ;;  %v4864_v33 = vld [vmem:[%s6071_s7 + $0x180] sm:$0xff]  }
  0x2e   : > { %4358 = vmatpush3.bf16.msra.mxu0 %v4856_v35  ;;  %v5318_v35 = vrot.slane %v838_v27, 7 }
  0x2f   : > { %4359 = vmatprep.subr.bf16.mxu0 %v4858_v37  ;;  %v841_v37 = vshll.u32 %v5301_v26, 16 }
  0x32   : > { %4360 = vmatpush3.bf16.msra.mxu0 %v4860_v39  ;;  %v808_v39 = vrot.slane %v806_v30, 7  ;;  %v4890_v30 = vld [vmem:[%s6071_s7 + $0x1f8] sm:$0xff]  }
  0x33   : > { %4413 = vmatprep.subr.bf16.mxu0 %v4862_v41 }
  0x93   : > { %v5275_v46 = vpop.permute.xlu1 %590  ;;  %v684_v47 = vpop.permute.xlu0 %683 }
  0x94   : > { %v696_v48 = vmul.f32 %v3969_v44, %v684_v47  ;;  %v843_v47 = vor.u32 %v841_v37, %v5318_v35 }
  0x96   : > { %v705_v50 = vadd.f32 %v3970_v45, %v696_v48 }
  0x97   : > { %v5277_v51 = vpop.permute.xlu1 %595  ;;  %v688_v52 = vpop.permute.xlu0 %687 }
  0x98   : > { %v697_v53 = vmul.f32 %v3969_v44, %v688_v52  ;;  %v707_v55 = vmul.f32 %v705_v50, %v5275_v46 }
  0x9a   : > { %v706_v56 = vadd.f32 %v3970_v45, %v697_v53  ;;  %v4870_v53 = vld [vmem:[%s6071_s7 + $0x1d0] sm:$0xff]  }
  0x9c   : > { %v716_v57 = vpop.permute.xlu1 %715  ;;  %v708_v58 = vmul.f32 %v706_v56, %v5277_v51  ;;  %v712_v60 = vpop.permute.xlu0 %711  ;;  %v4872_v56 = vld [vmem:[%s6071_s7 + $0x190] sm:$0xff]  }
  0x9d   : > { %v719_v59 = vmul.f32 %v3969_v44, %v716_v57  ;;  %v718_v62 = vmul.f32 %v3969_v44, %v712_v60  ;;  %v4867_v44 = vld [vmem:[%s6071_s7 + $0x100] sm:$0xff]  }
  0x9e   : > { %v5281_v0 = vpack.c.bf16 %v708_v58, %v707_v55  ;;  %v4871_v55 = vld [vmem:[%s6071_s7 + $0x108] sm:$0xff]  }
  0x9f   : > { %v721_v1 = vadd.f32 %v3970_v45, %v719_v59  ;;  %v720_v3 = vadd.f32 %v3970_v45, %v718_v62  ;;  %v4868_v45 = vld [vmem:[%s6071_s7 + $0x188] sm:$0xff]   ;;  %v4873_v59 = vld [vmem:[%s6071_s7 + $0x150] sm:$0xff]  }
  0xa0   : > { %727 = vst [vmem:[#allocation2 + $0x18] sm:$0xff] %v5281_v0  ;;  %v1031_v5 = vrot.slane %v5281_v0, 7  ;;  %v822_v6 = vshrl.u32 %v5281_v0, 16  ;;  %v825_v7 = vshll.u32 %v5281_v0, 16 }
  0xa1   : > { %v723_v4 = vmul.f32 %v721_v1, %v5277_v51  ;;  %v722_v8 = vmul.f32 %v720_v3, %v5275_v46  ;;  %v4875_v3 = vld [vmem:[%s6071_s7 + $0x110] sm:$0xff]  }
  0xa2   : > { %v1032_v9 = vsel %vm1026_vm2, %v1030_v61, %v1031_v5  ;;  %v824_v10 = vrot.slane %v822_v6, 7  ;;  %v1445_v11 = vrot.slane %v825_v7, 1  ;;  %v1036_v42 = vsel %vm1026_vm2, %v1031_v5, %v5307_v31  ;;  %v4874_v61 = vld [vmem:[%s6071_s7 + $0x1d8] sm:$0xff]  }
  0xa3   : > { %v5290_v12 = vpack.c.bf16 %v723_v4, %v722_v8  ;;  %1175 = vmatprep.mubr.bf16.mxu0 %v1032_v9  ;;  %v4876_v4 = vld [vmem:[%s6071_s7 + $0x198] sm:$0xff]   ;;  %v4878_v8 = vld [vmem:[%s6071_s7 + $0x1e0] sm:$0xff]  }
  0xa4   : > { %v827_v13 = vor.u32 %v825_v7, %v824_v10  ;;  %v5292_v14 = vor.u32 %v1445_v11, %v822_v6  ;;  %v844_v54 = vsel %vm804_vm3, %v824_v10, %v843_v47  ;;  %v4877_v6 = vld [vmem:[%s6071_s7 + $0x158] sm:$0xff]  }
  0xa5   : > { %728 = vst [vmem:[#allocation2 + $0x38] sm:$0xff] %v5290_v12  ;;  %v854_v48 = vshrl.u32 %v5290_v12, 16  ;;  %v857_v62 = vshll.u32 %v5290_v12, 16  ;;  %v4879_v11 = vld [vmem:[%s6071_s7 + $0x118] sm:$0xff]  }
  0xa6   : > { %v828_v15 = vsel %vm804_vm3, %v820_v63, %v827_v13  ;;  %v4880_v13 = vld [vmem:[%s6071_s7 + $0x1a0] sm:$0xff]  }
  0xa7   : > { %995 = vmatprep.mubr.bf16.mxu1 %v828_v15  ;;  %v856_v58 = vrot.slane %v854_v48, 7  ;;  %v4881_v15 = vld [vmem:[%s6071_s7 + $0x160] sm:$0xff]  }
  0xa9   : > { %v859_v5 = vor.u32 %v857_v62, %v856_v58  ;;  %v4902_v58 = vld [vmem:[%s6071_s7 + $0x218] sm:$0xff]  }
  0xab   : > { %v860_v10 = vsel %vm804_vm3, %v5318_v35, %v859_v5  ;;  %v4906_v5 = vld [vmem:[%s6071_s7 + $0x228] sm:$0xff]  }
  0xac   : > { %v736_v50 = vld [vmem:[#allocation2 + $0x38] sm:$0x7f] }
  0xad   : > { %v1039_v57 = vrot.slane %v736_v50, 7  ;;  %v4899_v50 = vld [vmem:[%s6071_s7 + $0x250] sm:$0xff]  }
  0xaf   : > { %v1040_v1 = vsel %vm1026_vm2, %v5307_v31, %v1039_v57 }
  0xe6   : > { %v671_v17 = vpop.f32.mrb[0].mxu0 }
  0xe7   : > { %v672_v18 = vadd.f32 %v3964_v16, %v671_v17  ;;  %v4724_v19 = vpop.f32.mrb[1].mxu0  ;;  %v1450_v17 = vrot.slane %v841_v37, 1 }
  0xe8   : > { %v674_v20 = vpop.f32.mrb[2].mxu0 }
  0xe9   : > { %v675_v21 = vadd.f32 %v3964_v16, %v674_v20  ;;  %v4725_v22 = vpop.f32.mrb[3].mxu0  ;;  %v678_v24 = vmul.f32 %v672_v18, %v5275_v46  ;;  %v4882_v18 = vld [vmem:[%s6071_s7 + $0x1e8] sm:$0xff]   ;;  %v1451_v19 = vsel %vm1427_vm4, %v5292_v14, %v1450_v17  ;;  %v4883_v20 = vld [vmem:[%s6071_s7 + $0x120] sm:$0xff]   ;;  %v4886_v14 = vld [vmem:[%s6071_s7 + $0x1f0] sm:$0xff]   ;;  %v1462_v37 = vor.u32 %v1450_v17, %v838_v27 }
  0xea   : > { %v4885_v22 = vld [vmem:[%s6071_s7 + $0x168] sm:$0xff]  }
  0xeb   : > { %v679_v25 = vmul.f32 %v675_v21, %v5277_v51  ;;  %v4884_v21 = vld [vmem:[%s6071_s7 + $0x1a8] sm:$0xff]  }
  0xed   : > { %v5304_v28 = vpack.c.bf16 %v679_v25, %v678_v24  ;;  %v4887_v24 = vld [vmem:[%s6071_s7 + $0x128] sm:$0xff]   ;;  %v4888_v25 = vld [vmem:[%s6071_s7 + $0x1b0] sm:$0xff]  }
  0xef   : > { %725 = vst [vmem:[#allocation2 + $0x10] sm:$0xff] %v5304_v28  ;;  %726 = vst [vmem:[#allocation2 + $0x30] sm:$0xff] %v5304_v28  ;;  %v1028_v32 = vrot.slane %v5304_v28, 7  ;;  %v810_v34 = vshrl.u32 %v5304_v28, 16  ;;  %v813_v41 = vshll.u32 %v5304_v28, 16 }
  0xf1   : > { %v1029_v38 = vsel %vm1026_vm2, %v1027_v29, %v1028_v32  ;;  %v812_v40 = vrot.slane %v810_v34, 7  ;;  %v1034_v60 = vsel %vm1026_vm2, %v1028_v32, %v5307_v31  ;;  %v4889_v29 = vld [vmem:[%s6071_s7 + $0x170] sm:$0xff]   ;;  %v1433_v32 = vrot.slane %v813_v41, 1 }
  0xf2   : > { %1176 = vmatmul.mubr.bf16.vlgmr.msra.gmra.mrb[4].mxu0 %v1029_v38  ;;  %v4894_v38 = vld [vmem:[%s6071_s7 + $0x138] sm:$0xff]  }
  0xf3   : > { %4414 = vmatpush3.bf16.msra.mxu0 %v4864_v33  ;;  %1183 = vmatprep.mubr.bf16.mxu0 %v1036_v42  ;;  %v5332_v43 = vor.u32 %v813_v41, %v812_v40  ;;  %v836_v7 = vsel %vm804_vm3, %v812_v40, %v843_v47  ;;  %v4891_v33 = vld [vmem:[%s6071_s7 + $0x130] sm:$0xff]   ;;  %v1466_v40 = vrot.slane %v857_v62, 1  ;;  %v4895_v41 = vld [vmem:[%s6071_s7 + $0x240] sm:$0xff]  }
  0xf4   : > { %4415 = vmatprep.subr.bf16.mxu0 %v4866_v36  ;;  %v1434_v36 = vor.u32 %v1433_v32, %v810_v34 }
  0xf5   : > { %v816_v52 = vsel %vm804_vm3, %v808_v39, %v5332_v43  ;;  %v852_v23 = vsel %vm804_vm3, %v5318_v35, %v5332_v43  ;;  %v4893_v35 = vld [vmem:[%s6071_s7 + $0x178] sm:$0xff]   ;;  %v5449_v39 = vld [vmem:[#allocation2 + $0x48] sm:$0x1]  ;;  %v1467_v27 = vsel %vm1427_vm4, %v1462_v37, %v1466_v40  ;;  %v4896_v43 = vld [vmem:[%s6071_s7 + $0x200] sm:$0xff]  }
  0xf6   : > { %996 = vmatmul.mubr.bf16.vlgmr.msra.gmra.mrb[0].mxu1 %v816_v52  ;;  %v735_v63 = vld [vmem:[#allocation2 + $0x30] sm:$0x7f]  ;;  %v1439_v34 = vsel %vm1427_vm4, %v1434_v36, %v1450_v17  ;;  %v1480_v42 = vshll.u32 %v5449_v39, 16  ;;  %v1392_v52 = vld [vmem:[#allocation2 + $0x40] sm:$0x1]  ;;  %v1695_v17 = vrot.slane %v5304_v28, 1 }
  0xf7   : > { %4380 = vmatpush3.bf16.msra.mxu1 %v4867_v44  ;;  %4416 = vmatpush3.bf16.msra.mxu0 %v4868_v45  ;;  %v1037_v9 = vrot.slane %v735_v63, 7  ;;  %v4897_v44 = vld [vmem:[%s6071_s7 + $0x248] sm:$0xff]   ;;  %v1478_v45 = vor.u32 %v1466_v40, %v854_v48  ;;  %v4904_v63 = vld [vmem:[%s6071_s7 + $0x220] sm:$0xff]  }
  0xf8   : > { %1003 = vmatprep.mubr.bf16.mxu1 %v844_v54  ;;  %4381 = vmatprep.subr.bf16.mxu1 %v4869_v49  ;;  %v1482_v47 = vrot.slane %v1480_v42, 1  ;;  %v4898_v49 = vld [vmem:[%s6071_s7 + $0x208] sm:$0xff]   ;;  %v1472_v54 = vshll.u32 %v1392_v52, 16  ;;  %v4927_v40 = vld [vmem:[%s6073_s9 + $0xa0] sm:$0xff]  }
  0xf9   : > { %4417 = vmatprep.subr.bf16.mxu0 %v4870_v53  ;;  %v1038_v16 = vsel %vm1026_vm2, %v5307_v31, %v1037_v9  ;;  %v1459_v53 = vsel %vm1427_vm4, %v1462_v37, %v1433_v32  ;;  %v1645_v9 = vld [vmem:[#allocation2 + $0x10] sm:$0xfe]  ;;  %v4931_v42 = vld [vmem:[%s6073_s9 + $0xa8] sm:$0xff]  }
  0xfa   : > { %1184 = vmatmul.mubr.bf16.gmra.mrb[8].mxu0 %v1034_v60  ;;  %v1483_v48 = vsel %vm1427_vm4, %v1478_v45, %v1482_v47  ;;  %v1474_v57 = vrot.slane %v1472_v54, 1  ;;  %v4903_v60 = vld [vmem:[%s6071_s7 + $0x260] sm:$0xff]   ;;  %v4919_v32 = vld [vmem:[%s6073_s9 + $0x90] sm:$0xff]   ;;  %v4934_v45 = vld [vmem:[%s6073_s9 + $0x68] sm:$0xff]  }
  0xfb   : > { %4382 = vmatpush3.bf16.msra.mxu1 %v4871_v55  ;;  %4418 = vmatpush3.bf16.msra.mxu0 %v4872_v56  ;;  %v4900_v55 = vld [vmem:[%s6071_s7 + $0x210] sm:$0xff]   ;;  %v4901_v56 = vld [vmem:[%s6071_s7 + $0x258] sm:$0xff]  }
  0xfc   : > { %1189 = vmatprep.mubr.bf16.mxu0 %v1040_v1  ;;  %4383 = vmatprep.subr.bf16.mxu1 %v4873_v59  ;;  %v1646_v59 = vld [vmem:[#allocation2 + $0x18] sm:$0xfe]  ;;  %v5496_v1 = vrot.slane %v5301_v26, 1  ;;  %v4924_v37 = vld [vmem:[%s6073_s9 + $0x10] sm:$0xff]  }
  0xfd   : > { %4419 = vmatprep.subr.bf16.mxu0 %v4874_v61  ;;  %v1475_v61 = vsel %vm1427_vm4, %v1434_v36, %v1474_v57  ;;  %v1692_v62 = vrot.slane %v1646_v59, 1  ;;  %v4923_v36 = vld [vmem:[%s6073_s9 + $0x98] sm:$0xff]   ;;  %v4935_v47 = vld [vmem:[%s6073_s9 + $0xb0] sm:$0xff]  }
  0xfe   : > { %1004 = vmatmul.mubr.bf16.gmra.mrb[4].mxu1 %v836_v7  ;;  %v4908_v7 = vld [vmem:[%s6071_s7 + $0x230] sm:$0xff]  }
  0xff   : > { %4384 = vmatpush3.bf16.msra.mxu1 %v4875_v3  ;;  %4420 = vmatpush3.bf16.msra.mxu0 %v4876_v4  ;;  %v4905_v3 = vld [vmem:[%s6071_s7 + $0x268] sm:$0xff]   ;;  %v1694_v4 = vsel %vm1688_vm5, %v1692_v62, %v5496_v1  ;;  %v4940_v54 = vld [vmem:[%s6073_s9 + $0x30] sm:$0xff]  }
 0x100   : > { %1009 = vmatprep.mubr.bf16.mxu1 %v860_v10  ;;  %4385 = vmatprep.subr.bf16.mxu1 %v4877_v6  ;;  %v4907_v6 = vld [vmem:[%s6071_s7 + $0x270] sm:$0xff]   ;;  %v4910_v10 = vld [vmem:[%s6071_s7 + $0x238] sm:$0xff]  }
 0x101   : > { %4421 = vmatprep.subr.bf16.mxu0 %v4878_v8  ;;  %v4909_v8 = vld [vmem:[%s6071_s7 + $0x278] sm:$0xff]  }
 0x102   : > { %1190 = vmatmul.mubr.bf16.gmra.mrb[12].mxu0 %v1038_v16 }
 0x103   : > { %4386 = vmatpush3.bf16.msra.mxu1 %v4879_v11  ;;  %4422 = vmatpush3.bf16.msra.mxu0 %v4880_v13  ;;  %v1689_v11 = vrot.slane %v1645_v9, 1  ;;  %v1697_v13 = vrot.slane %v5290_v12, 1 }
 0x104   : > { %1618 = vmatprep.mubr.bf16.mxu0 %v1451_v19  ;;  %4387 = vmatprep.subr.bf16.mxu1 %v4881_v15  ;;  %v1696_v19 = vsel %vm1688_vm5, %v5496_v1, %v1695_v17 }
 0x105   : > { %4423 = vmatprep.subr.bf16.mxu0 %v4882_v18  ;;  %v1691_v15 = vsel %vm1688_vm5, %v1689_v11, %v5496_v1  ;;  %v1698_v16 = vsel %vm1688_vm5, %v5496_v1, %v1697_v13  ;;  %v1701_v18 = vrot.slane %v5449_v39, 1  ;;  %v4926_v39 = vld [vmem:[%s6073_s9 + $0x58] sm:$0xff]  }
 0x106   : > { %1010 = vmatmul.mubr.bf16.gmra.mrb[8].mxu1 %v852_v23  ;;  %v4913_v23 = vld [vmem:[%s6073_s9 + $0xc8] sm:$0xff]  }
 0x107   : > { %4388 = vmatpush3.bf16.msra.mxu1 %v4883_v20  ;;  %4424 = vmatpush3.bf16.msra.mxu0 %v4884_v21  ;;  %v1702_v20 = vsel %vm1688_vm5, %v1697_v13, %v1701_v18 }
 0x108   : > { %1359 = vmatprep.mubr.bf16.mxu1 %v5281_v0  ;;  %4389 = vmatprep.subr.bf16.mxu1 %v4885_v22  ;;  %v4892_v0 = vld [vmem:[%s6071_s7 + $0x1b8] sm:$0xff]   ;;  %v4911_v22 = vld [vmem:[%s6073_s9 + $0xc0] sm:$0xff]  }
 0x109   : > { %4425 = vmatprep.subr.bf16.mxu0 %v4886_v14  ;;  %v4914_v14 = vld [vmem:[%s6073_s9 + $0x40] sm:$0xff]  }
 0x10b   : > { %4390 = vmatpush3.bf16.msra.mxu1 %v4887_v24  ;;  %4426 = vmatpush3.bf16.msra.mxu0 %v4888_v25  ;;  %v4915_v24 = vld [vmem:[%s6073_s9 + $0x88] sm:$0xff]   ;;  %v4916_v25 = vld [vmem:[%s6073_s9] sm:$0xff]  }
 0x10c   : > { %4391 = vmatprep.subr.bf16.mxu1 %v4889_v29  ;;  %4427 = vmatprep.subr.bf16.mxu0 %v4890_v30  ;;  %v4917_v29 = vld [vmem:[%s6073_s9 + $0xd0] sm:$0xff]   ;;  %v4918_v30 = vld [vmem:[%s6073_s9 + $0x48] sm:$0xff]  }
 0x10f   : > { %4392 = vmatpush3.bf16.msra.mxu1 %v4891_v33  ;;  %4428 = vmatpush3.bf16.msra.mxu0 %v4892_v0  ;;  %v4920_v33 = vld [vmem:[%s6073_s9 + $0x8] sm:$0xff]   ;;  %v4921_v0 = vld [vmem:[%s6073_s9 + $0xd8] sm:$0xff]  }
 0x110   : > { %4393 = vmatprep.subr.bf16.mxu1 %v4893_v35  ;;  %4481 = vmatprep.subr.bf16.mxu0 %v4911_v22  ;;  %v4922_v35 = vld [vmem:[%s6073_s9 + $0x50] sm:$0xff]  }
 0x112   : > { %1619 = vmatmul.mubr.bf16.vlgmr.msra.gmra.mrb[16].mxu0 %v1439_v34  ;;  %v4929_v34 = vld [vmem:[%s6073_s9 + $0xe8] sm:$0xff]  }
 0x113   : > { %4394 = vmatpush3.bf16.msra.mxu1 %v4894_v38  ;;  %1626 = vmatprep.mubr.bf16.mxu0 %v1467_v27  ;;  %v4925_v38 = vld [vmem:[%s6073_s9 + $0xe0] sm:$0xff]  }
 0x114   : > { %4447 = vmatprep.subr.bf16.mxu1 %v4895_v41  ;;  %v4928_v41 = vld [vmem:[%s6073_s9 + $0x18] sm:$0xff]   ;;  %v4930_v27 = vld [vmem:[%s6073_s9 + $0x60] sm:$0xff]  }
 0x116   : > { %1360 = vmatmul.mubr.bf16.vlgmr.msra.gmra.mrb[12].mxu1 %v5304_v28 }
 0x117   : > { %4448 = vmatpush3.bf16.msra.mxu1 %v4896_v43  ;;  %1367 = vmatprep.mubr.bf16.mxu1 %v5301_v26  ;;  %v4932_v43 = vld [vmem:[%s6073_s9 + $0x20] sm:$0xff]  }
 0x118   : > { %4449 = vmatprep.subr.bf16.mxu1 %v4897_v44  ;;  %v4933_v44 = vld [vmem:[%s6073_s9 + $0xf0] sm:$0xff]  }
 0x11a   : > { %1627 = vmatmul.mubr.bf16.gmra.mrb[20].mxu0 %v1459_v53  ;;  %v4939_v53 = vld [vmem:[%s6073_s9 + $0xb8] sm:$0xff]  }
 0x11b   : > { %1632 = vmatprep.mubr.bf16.mxu0 %v1483_v48  ;;  %4450 = vmatpush3.bf16.msra.mxu1 %v4898_v49  ;;  %v4936_v49 = vld [vmem:[%s6073_s9 + $0x28] sm:$0xff]   ;;  %v4941_v48 = vld [vmem:[%s6073_s9 + $0x78] sm:$0xff]  }
 0x11c   : > { %4451 = vmatprep.subr.bf16.mxu1 %v4899_v50  ;;  %v4937_v50 = vld [vmem:[%s6073_s9 + $0xf8] sm:$0xff]  }
 0x11e   : > { %1368 = vmatmul.mubr.bf16.gmra.mrb[16].mxu1 %v5301_v26 }
 0x11f   : > { %1373 = vmatprep.mubr.bf16.mxu1 %v5290_v12  ;;  %4452 = vmatpush3.bf16.msra.mxu1 %v4900_v55  ;;  %v1699_v12 = vrot.slane %v1392_v52, 1  ;;  %v4938_v52 = vld [vmem:[%s6073_s9 + $0x70] sm:$0xff]   ;;  %v4942_v55 = vld [vmem:[%s6073_s9 + $0x38] sm:$0xff]  }
 0x120   : > { %4453 = vmatprep.subr.bf16.mxu1 %v4901_v56 }
 0x121   : > { %v1700_v21 = vsel %vm1688_vm5, %v1695_v17, %v1699_v12 }
 0x122   : > { %1633 = vmatmul.mubr.bf16.gmra.mrb[24].mxu0 %v1475_v61 }
 0x123   : > { %4454 = vmatpush3.bf16.msra.mxu1 %v4902_v58 }
 0x124   : > { %4455 = vmatprep.subr.bf16.mxu1 %v4903_v60 }
 0x126   : > { %1374 = vmatmul.mubr.bf16.gmra.mrb[20].mxu1 %v5304_v28  ;;  %v4912_v28 = vld [vmem:[%s6073_s9 + $0x80] sm:$0xff]  }
 0x127   : > { %4456 = vmatpush3.bf16.msra.mxu1 %v4904_v63  ;;  %1837 = vmatprep.mubr.bf16.mxu1 %v1694_v4 }
 0x128   : > { %4457 = vmatprep.subr.bf16.mxu1 %v4905_v3  ;;  %4482 = vmatpush3.bf16.msra.mxu0 %v4912_v28 }
 0x129   : > { %4483 = vmatprep.subr.bf16.mxu0 %v4913_v23 }
 0x12b   : > { %4458 = vmatpush3.bf16.msra.mxu1 %v4906_v5 }
 0x12c   : > { %4459 = vmatprep.subr.bf16.mxu1 %v4907_v6  ;;  %4484 = vmatpush3.bf16.msra.mxu0 %v4915_v24 }
 0x12d   : > { %4485 = vmatprep.subr.bf16.mxu0 %v4917_v29 }
 0x12f   : > { %4460 = vmatpush3.bf16.msra.mxu1 %v4908_v7 }
 0x130   : > { %4461 = vmatprep.subr.bf16.mxu1 %v4909_v8  ;;  %4486 = vmatpush3.bf16.msra.mxu0 %v4919_v32 }
 0x131   : > { %4487 = vmatprep.subr.bf16.mxu0 %v4921_v0 }
 0x133   : > { %4462 = vmatpush3.bf16.msra.mxu1 %v4910_v10 }
 0x134   : > { %4515 = vmatprep.subr.bf16.mxu1 %v4914_v14  ;;  %4488 = vmatpush3.bf16.msra.mxu0 %v4923_v36 }
 0x135   : > { %4489 = vmatprep.subr.bf16.mxu0 %v4925_v38 }
 0x136   : > { %1838 = vmatmul.mubr.bf16.vlgmr.msra.gmra.mrb[24].mxu1 %v1691_v15 }
 0x137   : > { %1845 = vmatprep.mubr.bf16.mxu1 %v1698_v16  ;;  %4516 = vmatpush3.bf16.msra.mxu1 %v4916_v25 }
 0x138   : > { %4517 = vmatprep.subr.bf16.mxu1 %v4918_v30  ;;  %4490 = vmatpush3.bf16.msra.mxu0 %v4927_v40 }
 0x139   : > { %4491 = vmatprep.subr.bf16.mxu0 %v4929_v34 }
 0x13b   : > { %4518 = vmatpush3.bf16.msra.mxu1 %v4920_v33 }
 0x13c   : > { %4519 = vmatprep.subr.bf16.mxu1 %v4922_v35  ;;  %4492 = vmatpush3.bf16.msra.mxu0 %v4931_v42 }
 0x13d   : > { %4493 = vmatprep.subr.bf16.mxu0 %v4933_v44 }
 0x13e   : > { %1846 = vmatmul.mubr.bf16.gmra.mrb[28].mxu1 %v1696_v19 }
 0x13f   : > { %1851 = vmatprep.mubr.bf16.mxu1 %v1702_v20  ;;  %4520 = vmatpush3.bf16.msra.mxu1 %v4924_v37 }
 0x140   : > { %4521 = vmatprep.subr.bf16.mxu1 %v4926_v39  ;;  %4494 = vmatpush3.bf16.msra.mxu0 %v4935_v47 }
 0x141   : > { %4495 = vmatprep.subr.bf16.mxu0 %v4937_v50 }
 0x143   : > { %4522 = vmatpush3.bf16.msra.mxu1 %v4928_v41 }
 0x144   : > { %4523 = vmatprep.subr.bf16.mxu1 %v4930_v27  ;;  %4496 = vmatpush3.bf16.msra.mxu0 %v4939_v53 }
 0x145   : > { %4726 = vmatprep.subr.bf16.mxu0 %v5041_v2 }
 0x146   : > { %1852 = vmatmul.mubr.bf16.gmra.mrb[32].mxu1 %v1700_v21 }
 0x147   : > { %4524 = vmatpush3.bf16.msra.mxu1 %v4932_v43 }
 0x148   : > { %4525 = vmatprep.subr.bf16.mxu1 %v4934_v45 }
 0x14b   : > { %4526 = vmatpush3.bf16.msra.mxu1 %v4936_v49 }
 0x14c   : > { %4527 = vmatprep.subr.bf16.mxu1 %v4938_v52 }
 0x14f   : > { %4528 = vmatpush3.bf16.msra.mxu1 %v4940_v54 }
 0x150   : > { %4529 = vmatprep.subr.bf16.mxu1 %v4941_v48 }
 0x153   : > { %4530 = vmatpush3.bf16.msra.mxu1 %v4942_v55 }
 0x1c5   : > { %v4361_v56 = vpop.f32.mrb[4].mxu0 }
 0x1c6   : > { %v4362_v57 = vpop.f32.mrb[5].mxu0 }
 0x1c7   : > { %v4363_v58 = vadd.f32 %v4362_v57, %v4361_v56  ;;  %v4364_v59 = vpop.f32.mrb[6].mxu0 }
 0x1c8   : > { %v4365_v60 = vpop.f32.mrb[7].mxu0 }
 0x1c9   : > { %v4366_v61 = vadd.f32 %v4365_v60, %v4364_v59  ;;  %v4327_v62 = vpop.f32.mrb[0].mxu1 }
 0x1ca   : > { %v4328_v63 = vpop.f32.mrb[1].mxu1 }
 0x1cb   : > { %v4329_v3 = vadd.f32 %v4328_v63, %v4327_v62  ;;  %v4330_v4 = vpop.f32.mrb[2].mxu1 }
 0x1cc   : > { %v4331_v5 = vpop.f32.mrb[3].mxu1 }
 0x1cd   : > { %v1178_v6 = vadd.f32 %v4363_v58, %v4329_v3  ;;  %v4332_v7 = vadd.f32 %v4331_v5, %v4330_v4  ;;  %v4367_v8 = vpop.f32.mrb[8].mxu0 }
 0x1ce   : > { %v4368_v9 = vpop.f32.mrb[9].mxu0 }
 0x1cf   : > { %v1181_v10 = vadd.f32 %v4366_v61, %v4332_v7  ;;  %v4370_v11 = vpop.f32.mrb[10].mxu0 }
 0x1d0   : > { %v4371_v13 = vpop.f32.mrb[11].mxu0 }
 0x1d1   : > { %v4333_v15 = vpop.f32.mrb[4].mxu1 }
 0x1d2   : > { %v4334_v16 = vpop.f32.mrb[5].mxu1 }
 0x1d3   : > { %v4336_v17 = vpop.f32.mrb[6].mxu1 }
 0x1d4   : > { %v4337_v18 = vpop.f32.mrb[7].mxu1 }
 0x1d5   : > { %v4373_v19 = vpop.f32.mrb[12].mxu0 }
 0x1d6   : > { %v4374_v20 = vpop.f32.mrb[13].mxu0 }
 0x1d7   : > { %v4375_v12 = vadd.f32 %v4374_v20, %v4373_v19  ;;  %v4376_v21 = vpop.f32.mrb[14].mxu0  ;;  %v4179_v19 = vld [vmem:[%s6072_s8] ss:$0 sm:$0xff] }
 0x1d8   : > { %v4377_v22 = vpop.f32.mrb[15].mxu0 }
 0x1d9   : > { %v4378_v28 = vadd.f32 %v4377_v22, %v4376_v21  ;;  %v4339_v23 = vpop.f32.mrb[8].mxu1 }
 0x1da   : > { %v4340_v14 = vpop.f32.mrb[9].mxu1 }
 0x1db   : > { %v4341_v24 = vadd.f32 %v4340_v14, %v4339_v23  ;;  %v4342_v25 = vpop.f32.mrb[10].mxu1 }
 0x1dc   : > { %v4343_v29 = vpop.f32.mrb[11].mxu1 }
 0x1dd   : > { %v1192_v30 = vadd.f32 %v4375_v12, %v4341_v24  ;;  %v4344_v32 = vadd.f32 %v4343_v29, %v4342_v25 }
 0x1df   : > { %v1195_v33 = vadd.f32 %v4378_v28, %v4344_v32 }
 0x1e5   : > { %v4429_v0 = vpop.f32.mrb[16].mxu0 }
 0x1e6   : > { %v4430_v35 = vpop.f32.mrb[17].mxu0 }
 0x1e7   : > { %v4431_v36 = vadd.f32 %v4430_v35, %v4429_v0  ;;  %v4432_v37 = vpop.f32.mrb[18].mxu0  ;;  %v1896_v35 = vld [vmem:[#allocation2 + $0x20] sm:$0x1] }
 0x1e8   : > { %v4433_v38 = vpop.f32.mrb[19].mxu0 }
 0x1e9   : > { %v4434_v39 = vadd.f32 %v4433_v38, %v4432_v37  ;;  %v4395_v40 = vpop.f32.mrb[12].mxu1 }
 0x1ea   : > { %v4396_v41 = vpop.f32.mrb[13].mxu1 }
 0x1eb   : > { %v4397_v34 = vadd.f32 %v4396_v41, %v4395_v40  ;;  %v4398_v27 = vpop.f32.mrb[14].mxu1 }
 0x1ec   : > { %v4399_v42 = vpop.f32.mrb[15].mxu1 }
 0x1ed   : > { %v1382_v43 = vadd.f32 %v4397_v34, %v1178_v6  ;;  %v4400_v44 = vadd.f32 %v4399_v42, %v4398_v27  ;;  %v4435_v45 = vpop.f32.mrb[20].mxu0 }
 0x1ee   : > { %v4436_v47 = vpop.f32.mrb[21].mxu0 }
 0x1ef   : > { %v1383_v49 = vadd.f32 %v4400_v44, %v1181_v10  ;;  %v4438_v50 = vpop.f32.mrb[22].mxu0  ;;  %v1641_v52 = vadd.f32 %v4431_v36, %v1382_v43 }
 0x1f0   : > { %v4439_v53 = vpop.f32.mrb[23].mxu0 }
 0x1f1   : > { %v4401_v54 = vpop.f32.mrb[16].mxu1  ;;  %v1642_v48 = vadd.f32 %v4434_v39, %v1383_v49  ;;  %v1907_v39 = vshll.u32 %v1896_v35, 16  ;;  %v1928_v49 = vld [vmem:[#allocation2 + $0x8] sm:$0x80]  ;;  %v1927_v53 = vld [vmem:[#allocation2] sm:$0x80] }
 0x1f2   : > { %v4402_v55 = vpop.f32.mrb[17].mxu1  ;;  %v4950_v35 = vld [vmem:[%s6073_s9 + $0x138] sm:$0xff]  }
 0x1f3   : > { %v4404_v56 = vpop.f32.mrb[18].mxu1  ;;  %v1909_v47 = vrot.slane %v1907_v39, 1 }
 0x1f4   : > { %v4405_v57 = vpop.f32.mrb[19].mxu1  ;;  %v4943_v56 = vld [vmem:[%s6073_s9 + $0x100] sm:$0xff]  }
 0x1f5   : > { %v4441_v58 = vpop.f32.mrb[24].mxu0  ;;  %v2163_v57 = vrot.slane %v1928_v49, 7  ;;  %v4957_v49 = vld [vmem:[%s6075_s11 + $0xd0] sm:$0xff]  }
 0x1f6   : > { %v4442_v59 = vpop.f32.mrb[25].mxu0 }
 0x1f7   : > { %v4443_v60 = vadd.f32 %v4442_v59, %v4441_v58  ;;  %v4444_v61 = vpop.f32.mrb[26].mxu0 }
 0x1f8   : > { %v4445_v62 = vpop.f32.mrb[27].mxu0 }
 0x1f9   : > { %v4446_v63 = vadd.f32 %v4445_v62, %v4444_v61  ;;  %v4407_v3 = vpop.f32.mrb[20].mxu1 }
 0x1fa   : > { %v4408_v4 = vpop.f32.mrb[21].mxu1 }
 0x1fb   : > { %v4409_v5 = vadd.f32 %v4408_v4, %v4407_v3  ;;  %v4410_v6 = vpop.f32.mrb[22].mxu1 }
 0x1fc   : > { %v4411_v7 = vpop.f32.mrb[23].mxu1 }
 0x1fd   : > { %v1384_v8 = vadd.f32 %v4409_v5, %v1192_v30  ;;  %v4412_v9 = vadd.f32 %v4411_v7, %v4410_v6  ;;  %v4944_v6 = vld [vmem:[%s6073_s9 + $0x108] sm:$0xff]  }
 0x1ff   : > { %v1385_v10 = vadd.f32 %v4412_v9, %v1195_v33  ;;  %v1643_v11 = vadd.f32 %v4443_v60, %v1384_v8  ;;  %v2160_v60 = vrot.slane %v1927_v53, 7  ;;  %v4960_v53 = vld [vmem:[%s6075_s11 + $0x8] sm:$0xff]  }
 0x201   : > { %v1644_v13 = vadd.f32 %v4446_v63, %v1385_v10  ;;  %v1898_v10 = vld [vmem:[#allocation2 + $0x40] sm:$0x1] }
 0x209   : > { %v4463_v15 = vpop.f32.mrb[24].mxu1 }
 0x20a   : > { %v4464_v16 = vpop.f32.mrb[25].mxu1 }
 0x20b   : > { %v4465_v17 = vadd.f32 %v4464_v16, %v4463_v15  ;;  %v4466_v18 = vpop.f32.mrb[26].mxu1  ;;  %v4945_v15 = vld [vmem:[%s6073_s9 + $0x110] sm:$0xff]  }
 0x20c   : > { %v4467_v20 = vpop.f32.mrb[27].mxu1 }
 0x20d   : > { %v1860_v12 = vadd.f32 %v4465_v17, %v1641_v52  ;;  %v4468_v21 = vadd.f32 %v4467_v20, %v4466_v18  ;;  %v1921_v17 = vshll.u32 %v1898_v10, 16  ;;  %v4979_v10 = vld [vmem:[%s6075_s11 + $0xb8] sm:$0xff]  }
 0x20f   : > { %v1871_v22 = vadd.f32 %v4179_v19, %v1860_v12  ;;  %v1861_v28 = vadd.f32 %v4468_v21, %v1642_v48 }
 0x211   : > { %vm1875_vm6 = vcmp.gt.f32.partialorder %v1871_v22, 0.0  ;;  %v1879_v23 = vmul.f32 0.1, %v1871_v22  ;;  %v1872_v14 = vadd.f32 %v4179_v19, %v1861_v28  ;;  %v4469_v24 = vpop.f32.mrb[28].mxu1 }
 0x212   : > { %v4470_v25 = vpop.f32.mrb[29].mxu1 }
 0x213   : > { %v1883_v29 = vsel %vm1875_vm6, %v1871_v22, %v1879_v23  ;;  %vm1876_vm7 = vcmp.gt.f32.partialorder %v1872_v14, 0.0  ;;  %v1880_v30 = vmul.f32 0.1, %v1872_v14  ;;  %v4472_v32 = vpop.f32.mrb[30].mxu1  ;;  %v1923_v22 = vrot.slane %v1921_v17, 1  ;;  %v4949_v25 = vld [vmem:[%s6073_s9 + $0x130] sm:$0xff]  }
 0x214   : > { %v4473_v33 = vpop.f32.mrb[31].mxu1  ;;  %v1887_v36 = vmul.f32 %v1883_v29, %v5275_v46  ;;  %vm3755_vm6 = vcmask 130048  }
 0x215   : > { %v1884_v0 = vsel %vm1876_vm7, %v1872_v14, %v1880_v30  ;;  %v4948_v14 = vld [vmem:[%s6073_s9 + $0x128] sm:$0xff]   ;;  %vm3875_vm7 = vcmask 122880  }
 0x216   : > { %v1888_v37 = vmul.f32 %v1884_v0, %v5277_v51 }
 0x218   : > { %v1889_v38 = vpack.c.bf16 %v1888_v37, %v1887_v36 }
 0x219   : > { %v4475_v40 = vpop.f32.mrb[32].mxu1 }
 0x21a   : > { %1893 = vst [vmem:[#allocation2 + $0x10] sm:$0xff] %v1889_v38  ;;  %v4476_v41 = vpop.f32.mrb[33].mxu1  ;;  %v1902_v34 = vshll.u32 %v1889_v38, 16  ;;  %v1900_v44 = vshrl.u32 %v1889_v38, 16  ;;  %v2161_v59 = vrot.slane %v1889_v38, 7 }
 0x21b   : > { %v4477_v27 = vadd.f32 %v4476_v41, %v4475_v40  ;;  %v4478_v42 = vpop.f32.mrb[34].mxu1  ;;  %v2334_v41 = vld [vmem:[#allocation2 + $0x40] sm:$0x1] }
 0x21c   : > { %v4479_v43 = vpop.f32.mrb[35].mxu1  ;;  %v1904_v45 = vrot.slane %v1902_v34, 1  ;;  %v2162_v7 = vsel %vm1026_vm2, %v2160_v60, %v2161_v59  ;;  %v2167_v20 = vsel %vm1026_vm2, %v2161_v59, %v5307_v31  ;;  %v2360_v34 = vrot.slane %v2334_v41, 1  ;;  %v4967_v59 = vld [vmem:[%s6075_s11 + $0xa0] sm:$0xff]   ;;  %v4968_v60 = vld [vmem:[%s6075_s11 + $0x18] sm:$0xff]  }
 0x21d   : > { %v1862_v50 = vadd.f32 %v4477_v27, %v1643_v11  ;;  %v4480_v52 = vadd.f32 %v4479_v43, %v4478_v42  ;;  %v4951_v42 = vld [vmem:[%s6075_s11 + $0xc0] sm:$0xff]  }
 0x21e   : > { %v1905_v54 = vor.u32 %v1904_v45, %v1900_v44  ;;  %v4952_v43 = vld [vmem:[%s6075_s11 + $0x80] sm:$0xff]   ;;  %4560 = vmatprep.subr.bf16.mxu1 %v4951_v42  ;;  %v4955_v45 = vld [vmem:[%s6075_s11 + $0x88] sm:$0xff]  }
 0x21f   : > { %v1873_v48 = vadd.f32 %v4179_v19, %v1862_v50  ;;  %v1863_v55 = vadd.f32 %v4480_v52, %v1644_v13  ;;  %v4954_v44 = vld [vmem:[%s6075_s11 + $0x40] sm:$0xff]   ;;  %v4958_v50 = vld [vmem:[%s6075_s11 + $0x48] sm:$0xff]   ;;  %v4959_v52 = vld [vmem:[%s6075_s11 + $0x90] sm:$0xff]  }
 0x220   : > { %v1910_v58 = vsel %vm1427_vm4, %v1905_v54, %v1909_v47  ;;  %v4956_v47 = vld [vmem:[%s6075_s11] sm:$0xff]   ;;  %v4961_v54 = vld [vmem:[%s6075_s11 + $0xd8] sm:$0xff]  }
 0x221   : > { %vm1877_vm8 = vcmp.gt.f32.partialorder %v1873_v48, 0.0  ;;  %v1881_v61 = vmul.f32 0.1, %v1873_v48  ;;  %v1874_v62 = vadd.f32 %v4179_v19, %v1863_v55  ;;  %2129 = vmatprep.mubr.bf16.mxu0 %v1910_v58  ;;  %v2164_v63 = vrot.slane %v1910_v58, 7  ;;  %v4946_v19 = vld [vmem:[%s6073_s9 + $0x118] sm:$0xff]  }
 0x222   : > { %2130 = vmatmul.mubr.bf16.vlgmr.msra.gmra.mrb[28].mxu0 %v1889_v38  ;;  %v2331_v33 = vld [vmem:[#allocation2 + $0x10] sm:$0xfe]  ;;  %v4963_v55 = vld [vmem:[%s6075_s11 + $0x98] sm:$0xff]  }
 0x223   : > { %v1885_v3 = vsel %vm1877_vm8, %v1873_v48, %v1881_v61  ;;  %vm1878_vm9 = vcmp.gt.f32.partialorder %v1874_v62, 0.0  ;;  %v1882_v4 = vmul.f32 0.1, %v1874_v62  ;;  %4727 = vmatpush3.bf16.msra.mxu0 %v4943_v56  ;;  %v2165_v5 = vsel %vm1026_vm2, %v2163_v57, %v2164_v63  ;;  %2137 = vmatprep.mubr.bf16.mxu0 %v5301_v26  ;;  %v4962_v48 = vld [vmem:[%s6075_s11 + $0x50] sm:$0xff]   ;;  %v4965_v57 = vld [vmem:[%s6075_s11 + $0xe0] sm:$0xff]   ;;  %v4966_v58 = vld [vmem:[%s6075_s11 + $0x58] sm:$0xff]  }
 0x224   : > { %2308 = vmatprep.mubr.bf16.mxu1 %v2165_v5  ;;  %4728 = vmatprep.subr.bf16.mxu0 %v5041_v2  ;;  %v2169_v9 = vsel %vm1026_vm2, %v2164_v63, %v5307_v31  ;;  %v1890_v11 = vmul.f32 %v1885_v3, %v5275_v46  ;;  %v2355_v37 = vrot.slane %v2331_v33, 1  ;;  %v4964_v56 = vld [vmem:[%s6075_s11 + $0x10] sm:$0xff]   ;;  %v4969_v61 = vld [vmem:[%s6075_s11 + $0xe8] sm:$0xff]   ;;  %v4972_v3 = vld [vmem:[%s6075_s11 + $0x20] sm:$0xff]  }
 0x225   : > { %v1886_v8 = vsel %vm1878_vm9, %v1874_v62, %v1882_v4  ;;  %2309 = vmatmul.mubr.bf16.vlgmr.msra.gmra.mrb[36].mxu1 %v2162_v7  ;;  %v4970_v62 = vld [vmem:[%s6075_s11 + $0x60] sm:$0xff]   ;;  %v4971_v63 = vld [vmem:[%s6075_s11 + $0xa8] sm:$0xff]   ;;  %v4973_v4 = vld [vmem:[%s6075_s11 + $0xf0] sm:$0xff]  }
 0x226   : > { %v1891_v13 = vmul.f32 %v1886_v8, %v5277_v51  ;;  %2316 = vmatprep.mubr.bf16.mxu1 %v2169_v9  ;;  %v2357_v38 = vsel %vm1688_vm5, %v2355_v37, %v5496_v1  ;;  %4561 = vmatpush3.bf16.msra.mxu1 %v4952_v43  ;;  %v4974_v5 = vld [vmem:[%s6075_s11 + $0x68] sm:$0xff]   ;;  %v4977_v8 = vld [vmem:[%s6075_s11 + $0xf8] sm:$0xff]   ;;  %v4978_v9 = vld [vmem:[%s6075_s11 + $0x70] sm:$0xff]  }
 0x227   : > { %4729 = vmatpush3.bf16.msra.mxu0 %v4944_v6  ;;  %v4975_v6 = vld [vmem:[%s6075_s11 + $0xb0] sm:$0xff]   ;;  %v4976_v7 = vld [vmem:[%s6075_s11 + $0x28] sm:$0xff]  }
 0x228   : > { %v1892_v16 = vpack.c.bf16 %v1891_v13, %v1890_v11  ;;  %4730 = vmatprep.subr.bf16.mxu0 %v5041_v2  ;;  %v4980_v11 = vld [vmem:[%s6075_s11 + $0x30] sm:$0xff]   ;;  %v4981_v13 = vld [vmem:[%s6075_s11 + $0x78] sm:$0xff]  }
 0x22a   : > { %1894 = vst [vmem:[#allocation2 + $0x30] sm:$0xff] %v1892_v16  ;;  %2138 = vmatmul.mubr.bf16.gmra.mrb[32].mxu0 %v5301_v26  ;;  %v1916_v18 = vshll.u32 %v1892_v16, 16  ;;  %v1914_v12 = vshrl.u32 %v1892_v16, 16  ;;  %v4947_v26 = vld [vmem:[%s6073_s9 + $0x120] sm:$0xff]   ;;  %v2358_v39 = vrot.slane %v1892_v16, 1 }
 0x22b   : > { %4731 = vmatpush3.bf16.msra.mxu0 %v4945_v15  ;;  %v4982_v15 = vld [vmem:[%s6075_s11 + $0x38] sm:$0xff]  }
 0x22c   : > { %4732 = vmatprep.subr.bf16.mxu0 %v5041_v2  ;;  %v1918_v21 = vrot.slane %v1916_v18, 1  ;;  %v2359_v40 = vsel %vm1688_vm5, %v5496_v1, %v2358_v39  ;;  %v2361_v27 = vsel %vm1688_vm5, %v2358_v39, %v2360_v34  ;;  %v4953_v1 = vld [vmem:[%s6075_s11 + $0xc8] sm:$0xff]  }
 0x22d   : > { %2317 = vmatmul.mubr.bf16.gmra.mrb[40].mxu1 %v2167_v20  ;;  %4562 = vmatprep.subr.bf16.mxu1 %v4953_v1 }
 0x22e   : > { %v1919_v28 = vor.u32 %v1918_v21, %v1914_v12  ;;  %4563 = vmatpush3.bf16.msra.mxu1 %v4955_v45 }
 0x22f   : > { %4733 = vmatpush3.bf16.msra.mxu0 %v4946_v19  ;;  %4564 = vmatprep.subr.bf16.mxu1 %v4957_v49 }
 0x230   : > { %v1924_v23 = vsel %vm1427_vm4, %v1919_v28, %v1923_v22  ;;  %4734 = vmatprep.subr.bf16.mxu0 %v5041_v2 }
 0x231   : > { %1926 = vst [vmem:[#allocation2 + $0x38] sm:$0xff] %v1924_v23  ;;  %2143 = vmatprep.mubr.bf16.mxu0 %v1924_v23  ;;  %v1933_v24 = vld [vmem:[#allocation2 + $0x30] sm:$0x7f] }
 0x232   : > { %2144 = vmatmul.mubr.bf16.gmra.mrb[36].mxu0 %v1892_v16  ;;  %v2170_v30 = vrot.slane %v1933_v24, 7  ;;  %4565 = vmatpush3.bf16.msra.mxu1 %v4959_v52  ;;  %v4220_v52 = vld [vmem:[%s6074_s10] ss:$0 sm:$0xff] }
 0x233   : > { %4735 = vmatpush3.bf16.msra.mxu0 %v4947_v26  ;;  %4742 = vmatprep.mubr.msk.bf16.mxu0 %vm5042_vm0, %v5041_v2 }
 0x234   : > { %4736 = vmatprep.subr.bf16.mxu0 %v5041_v2  ;;  %v2171_v36 = vsel %vm1026_vm2, %v5307_v31, %v2170_v30  ;;  %4566 = vmatprep.subr.bf16.mxu1 %v4961_v54 }
 0x236   : > { %4567 = vmatpush3.bf16.msra.mxu1 %v4963_v55 }
 0x237   : > { %4737 = vmatpush3.bf16.msra.mxu0 %v4948_v14  ;;  %4568 = vmatprep.subr.bf16.mxu1 %v4965_v57 }
 0x238   : > { %v1934_v29 = vld [vmem:[#allocation2 + $0x38] sm:$0x7f]  ;;  %4738 = vmatprep.subr.bf16.mxu0 %v5041_v2 }
 0x239   : > { %v2172_v32 = vrot.slane %v1934_v29, 7 }
 0x23a   : > { %4569 = vmatpush3.bf16.msra.mxu1 %v4967_v59 }
 0x23b   : > { %v2173_v0 = vsel %vm1026_vm2, %v5307_v31, %v2172_v32  ;;  %4739 = vmatpush3.bf16.msra.mxu0 %v4949_v25  ;;  %4570 = vmatprep.subr.bf16.mxu1 %v4969_v61 }
 0x23c   : > { %2322 = vmatprep.mubr.bf16.mxu1 %v2173_v0  ;;  %4740 = vmatprep.subr.bf16.mxu0 %v5041_v2 }
 0x23d   : > { %2323 = vmatmul.mubr.bf16.gmra.mrb[44].mxu1 %v2171_v36 }
 0x23e   : > { %4571 = vmatpush3.bf16.msra.mxu1 %v4971_v63 }
 0x23f   : > { %4741 = vmatpush3.bf16.msra.mxu0 %v4950_v35  ;;  %4572 = vmatprep.subr.bf16.mxu1 %v4973_v4 }
 0x240   : > { %4594 = vmatprep.subr.bf16.mxu0 %v4954_v44 }
 0x242   : > { %4743 = vmatmul.mubr.bf16.vlgmr.msra.gmra.mrb[40].mxu0 %v2357_v38  ;;  %4573 = vmatpush3.bf16.msra.mxu1 %v4975_v6 }
 0x243   : > { %4746 = vmatprep.mubr.msk.bf16.mxu0 %vm5042_vm0, %v5041_v2  ;;  %4595 = vmatpush3.bf16.msra.mxu0 %v4956_v47 }
 0x244   : > { %4596 = vmatprep.subr.bf16.mxu0 %v4958_v50  ;;  %4574 = vmatprep.subr.bf16.mxu1 %v4977_v8 }
 0x246   : > { %4575 = vmatpush3.bf16.msra.mxu1 %v4979_v10 }
 0x247   : > { %4597 = vmatpush3.bf16.msra.mxu0 %v4960_v53  ;;  %4754 = vmatprep.subr.bf16.mxu1 %v5041_v2 }
 0x248   : > { %4598 = vmatprep.subr.bf16.mxu0 %v4962_v48 }
 0x24a   : > { %4747 = vmatmul.mubr.bf16.gmra.mrb[44].mxu0 %v2359_v40 }
 0x24b   : > { %4750 = vmatprep.mubr.msk.bf16.mxu0 %vm5042_vm0, %v5041_v2  ;;  %4599 = vmatpush3.bf16.msra.mxu0 %v4964_v56 }
 0x24c   : > { %4600 = vmatprep.subr.bf16.mxu0 %v4966_v58 }
 0x24f   : > { %4601 = vmatpush3.bf16.msra.mxu0 %v4968_v60 }
 0x250   : > { %4602 = vmatprep.subr.bf16.mxu0 %v4970_v62 }
 0x252   : > { %4751 = vmatmul.mubr.bf16.gmra.mrb[48].mxu0 %v2361_v27 }
 0x253   : > { %4603 = vmatpush3.bf16.msra.mxu0 %v4972_v3 }
 0x254   : > { %4604 = vmatprep.subr.bf16.mxu0 %v4974_v5  ;;  %v2504_v5 = vld [vmem:[#allocation2 + $0x20] sm:$0x1] }
 0x257   : > { %4605 = vmatpush3.bf16.msra.mxu0 %v4976_v7 }
 0x258   : > { %4606 = vmatprep.subr.bf16.mxu0 %v4978_v9 }
 0x25b   : > { %4607 = vmatpush3.bf16.msra.mxu0 %v4980_v11  ;;  %v2515_v11 = vshll.u32 %v2504_v5, 16  ;;  %v4990_v5 = vld [vmem:[%s6075_s11 + $0x138] sm:$0xff]  }
 0x25c   : > { %4608 = vmatprep.subr.bf16.mxu0 %v4981_v13 }
 0x25f   : > { %4609 = vmatpush3.bf16.msra.mxu0 %v4982_v15 }
 0x2f5   : > { %v4497_v16 = vpop.f32.mrb[28].mxu0 }
 0x2f6   : > { %v4498_v17 = vpop.f32.mrb[29].mxu0 }
 0x2f7   : > { %v4499_v18 = vadd.f32 %v4498_v17, %v4497_v16  ;;  %v4500_v19 = vpop.f32.mrb[30].mxu0 }
 0x2f8   : > { %v4501_v20 = vpop.f32.mrb[31].mxu0  ;;  %v4531_v12 = vpop.f32.mrb[36].mxu1 }
 0x2f9   : > { %v4502_v21 = vadd.f32 %v4501_v20, %v4500_v19  ;;  %v4532_v22 = vpop.f32.mrb[37].mxu1  ;;  %v2536_v19 = vld [vmem:[#allocation2 + $0x8] sm:$0x80] }
 0x2fa   : > { %v4533_v28 = vadd.f32 %v4532_v22, %v4531_v12  ;;  %v4534_v26 = vpop.f32.mrb[38].mxu1 }
 0x2fb   : > { %v4535_v23 = vpop.f32.mrb[39].mxu1 }
 0x2fc   : > { %v4536_v14 = vadd.f32 %v4535_v23, %v4534_v26  ;;  %v2311_v24 = vadd.f32 %v4533_v28, %v4499_v18  ;;  %v2517_v18 = vrot.slane %v2515_v11, 1 }
 0x2fd   : > { %v4503_v25 = vpop.f32.mrb[32].mxu0 }
 0x2fe   : > { %v4504_v29 = vpop.f32.mrb[33].mxu0  ;;  %v2314_v30 = vadd.f32 %v4536_v14, %v4502_v21  ;;  %v2535_v21 = vld [vmem:[#allocation2] sm:$0x80]  ;;  %v2771_v25 = vrot.slane %v2536_v19, 7 }
 0x2ff   : > { %v4506_v32 = vpop.f32.mrb[34].mxu0  ;;  %v4994_v19 = vld [vmem:[%s6077_s13 + $0x40] sm:$0xff]  }
 0x300   : > { %v4537_v33 = vpop.f32.mrb[40].mxu1  ;;  %v4507_v0 = vpop.f32.mrb[35].mxu0  ;;  %v2768_v32 = vrot.slane %v2535_v21, 7  ;;  %v4997_v21 = vld [vmem:[%s6077_s13 + $0xd0] sm:$0xff]  }
 0x301   : > { %v4538_v35 = vpop.f32.mrb[41].mxu1 }
 0x302   : > { %v4540_v36 = vpop.f32.mrb[42].mxu1 }
 0x303   : > { %v4541_v37 = vpop.f32.mrb[43].mxu1 }
 0x305   : > { %v4509_v38 = vpop.f32.mrb[36].mxu0 }
 0x306   : > { %v4510_v39 = vpop.f32.mrb[37].mxu0 }
 0x307   : > { %v4511_v40 = vadd.f32 %v4510_v39, %v4509_v38  ;;  %v4512_v41 = vpop.f32.mrb[38].mxu0  ;;  %v4984_v39 = vld [vmem:[%s6075_s11 + $0x108] sm:$0xff]  }
 0x308   : > { %v4513_v34 = vpop.f32.mrb[39].mxu0 }
 0x309   : > { %v4514_v27 = vadd.f32 %v4513_v34, %v4512_v41 }
 0x310   : > { %v4543_v42 = vpop.f32.mrb[44].mxu1 }
 0x311   : > { %v4544_v43 = vpop.f32.mrb[45].mxu1 }
 0x312   : > { %v4545_v1 = vadd.f32 %v4544_v43, %v4543_v42  ;;  %v4546_v44 = vpop.f32.mrb[46].mxu1  ;;  %v2506_v42 = vld [vmem:[#allocation2 + $0x40] sm:$0x1] }
 0x313   : > { %v4547_v45 = vpop.f32.mrb[47].mxu1 }
 0x314   : > { %v4548_v47 = vadd.f32 %v4547_v45, %v4546_v44  ;;  %v2325_v49 = vadd.f32 %v4545_v1, %v4511_v40  ;;  %v5800_v40 = vld [vmem:[#allocation2] sm:$0xff]  ;;  %v4985_v44 = vld [vmem:[%s6075_s11 + $0x110] sm:$0xff]  }
 0x315   : > { %v2447_v50 = vpop.f32.mrb[40].mxu0 }
 0x316   : > { %v2468_v53 = vadd.f32 %v2447_v50, %v2311_v24  ;;  %v4744_v54 = vpop.f32.mrb[41].mxu0  ;;  %v2328_v48 = vadd.f32 %v4548_v47, %v4514_v27  ;;  %v4983_v24 = vld [vmem:[%s6075_s11 + $0x100] sm:$0xff]   ;;  %v2529_v47 = vshll.u32 %v2506_v42, 16  ;;  %v4986_v50 = vld [vmem:[%s6075_s11 + $0x118] sm:$0xff]   ;;  %v5018_v42 = vld [vmem:[%s6077_s13 + $0x70] sm:$0xff]  }
 0x317   : > { %v2450_v55 = vpop.f32.mrb[42].mxu0 }
 0x318   : > { %v2479_v56 = vadd.f32 %v4220_v52, %v2468_v53  ;;  %v2469_v57 = vadd.f32 %v2450_v55, %v2314_v30  ;;  %v4745_v58 = vpop.f32.mrb[43].mxu0 }
 0x319   : > { %v4988_v58 = vld [vmem:[%s6075_s11 + $0x128] sm:$0xff]  }
 0x31a   : > { %vm2483_vm10 = vcmp.gt.f32.partialorder %v2479_v56, 0.0  ;;  %v2487_v59 = vmul.f32 0.1, %v2479_v56  ;;  %v2480_v60 = vadd.f32 %v4220_v52, %v2469_v57 }
 0x31c   : > { %v2491_v61 = vsel %vm2483_vm10, %v2479_v56, %v2487_v59  ;;  %vm2484_vm11 = vcmp.gt.f32.partialorder %v2480_v60, 0.0  ;;  %v2488_v62 = vmul.f32 0.1, %v2480_v60  ;;  %v4987_v56 = vld [vmem:[%s6075_s11 + $0x120] sm:$0xff]  }
 0x31d   : > { %v2455_v63 = vpop.f32.mrb[44].mxu0  ;;  %v2495_v6 = vmul.f32 %v2491_v61, %v5275_v46 }
 0x31e   : > { %v2492_v3 = vsel %vm2484_vm11, %v2480_v60, %v2488_v62  ;;  %v4748_v4 = vpop.f32.mrb[45].mxu0  ;;  %v4989_v60 = vld [vmem:[%s6075_s11 + $0x130] sm:$0xff]  }
 0x31f   : > { %v2496_v7 = vmul.f32 %v2492_v3, %v5277_v51  ;;  %v2457_v8 = vpop.f32.mrb[46].mxu0 }
 0x320   : > { %v4749_v9 = vpop.f32.mrb[47].mxu0  ;;  %v5844_v8 = vrot.slane %v5800_v40, 1 }
 0x321   : > { %v2497_v10 = vpack.c.bf16 %v2496_v7, %v2495_v6 }
 0x323   : > { %2501 = vst [vmem:[#allocation2 + $0x10] sm:$0xff] %v2497_v10  ;;  %v2510_v13 = vshll.u32 %v2497_v10, 16  ;;  %v2508_v16 = vshrl.u32 %v2497_v10, 16  ;;  %v2769_v30 = vrot.slane %v2497_v10, 7 }
 0x325   : > { %v2461_v15 = vpop.f32.mrb[48].mxu0  ;;  %v2512_v17 = vrot.slane %v2510_v13, 1  ;;  %v2770_v41 = vsel %vm1026_vm2, %v2768_v32, %v2769_v30  ;;  %v5007_v32 = vld [vmem:[%s6077_s13 + $0xa0] sm:$0xff]  }
 0x326   : > { %v2470_v20 = vadd.f32 %v2461_v15, %v2325_v49  ;;  %v4752_v12 = vpop.f32.mrb[49].mxu0 }
 0x327   : > { %v2464_v22 = vpop.f32.mrb[50].mxu0  ;;  %v2513_v28 = vor.u32 %v2512_v17, %v2508_v16  ;;  %v4991_v16 = vld [vmem:[%s6077_s13 + $0xc0] sm:$0xff]  }
 0x328   : > { %v2481_v26 = vadd.f32 %v4220_v52, %v2470_v20  ;;  %v2471_v23 = vadd.f32 %v2464_v22, %v2328_v48  ;;  %v4753_v14 = vpop.f32.mrb[51].mxu0  ;;  %v2531_v48 = vrot.slane %v2529_v47, 1  ;;  %v4992_v17 = vld [vmem:[%s6077_s13 + $0x80] sm:$0xff]   ;;  %4639 = vmatprep.subr.bf16.mxu0 %v4991_v16  ;;  %v4995_v20 = vld [vmem:[%s6077_s13 + $0x88] sm:$0xff]  }
 0x329   : > { %v2518_v29 = vsel %vm1427_vm4, %v2513_v28, %v2517_v18  ;;  %v4993_v18 = vld [vmem:[%s6077_s13 + $0xc8] sm:$0xff]   ;;  %v4996_v12 = vld [vmem:[%s6077_s13] sm:$0xff]   ;;  %v4999_v28 = vld [vmem:[%s6077_s13 + $0x90] sm:$0xff]  }
 0x32a   : > { %vm2485_vm12 = vcmp.gt.f32.partialorder %v2481_v26, 0.0  ;;  %v2489_v33 = vmul.f32 0.1, %v2481_v26  ;;  %v2482_v0 = vadd.f32 %v4220_v52, %v2471_v23  ;;  %2737 = vmatprep.mubr.bf16.mxu1 %v2518_v29  ;;  %v2772_v35 = vrot.slane %v2518_v29, 7  ;;  %v2939_v3 = vld [vmem:[#allocation2 + $0x10] sm:$0xfe] }
 0x32b   : > { %2738 = vmatmul.mubr.bf16.vlgmr.msra.gmra.mrb[48].mxu1 %v2497_v10  ;;  %v2775_v52 = vsel %vm1026_vm2, %v2769_v30, %v5307_v31  ;;  %v2963_v7 = vrot.slane %v2939_v3, 1  ;;  %v4998_v22 = vld [vmem:[%s6077_s13 + $0x48] sm:$0xff]   ;;  %v5001_v23 = vld [vmem:[%s6077_s13 + $0xd8] sm:$0xff]   ;;  %v5002_v14 = vld [vmem:[%s6077_s13 + $0x50] sm:$0xff]  }
 0x32c   : > { %v2493_v36 = vsel %vm2485_vm12, %v2481_v26, %v2489_v33  ;;  %vm2486_vm13 = vcmp.gt.f32.partialorder %v2482_v0, 0.0  ;;  %v2490_v37 = vmul.f32 0.1, %v2482_v0  ;;  %4755 = vmatpush3.bf16.msra.mxu1 %v4983_v24  ;;  %v2773_v38 = vsel %vm1026_vm2, %v2771_v25, %v2772_v35  ;;  %2745 = vmatprep.mubr.bf16.mxu1 %v5800_v40  ;;  %v5000_v26 = vld [vmem:[%s6077_s13 + $0x8] sm:$0xff]   ;;  %v5003_v24 = vld [vmem:[%s6077_s13 + $0x98] sm:$0xff]   ;;  %v5004_v25 = vld [vmem:[%s6077_s13 + $0x10] sm:$0xff]  }
 0x32d   : > { %2916 = vmatprep.mubr.bf16.mxu0 %v2773_v38  ;;  %4756 = vmatprep.subr.bf16.mxu1 %v5041_v2  ;;  %v2777_v27 = vsel %vm1026_vm2, %v2772_v35, %v5307_v31  ;;  %v2498_v43 = vmul.f32 %v2493_v36, %v5275_v46  ;;  %v2965_v9 = vsel %vm1688_vm5, %v2963_v7, %v5844_v8  ;;  %v5005_v29 = vld [vmem:[%s6077_s13 + $0xe0] sm:$0xff]   ;;  %v5006_v30 = vld [vmem:[%s6077_s13 + $0x58] sm:$0xff]   ;;  %v5011_v36 = vld [vmem:[%s6077_s13 + $0xa8] sm:$0xff]  }
 0x32e   : > { %v2494_v34 = vsel %vm2486_vm13, %v2482_v0, %v2490_v37  ;;  %2917 = vmatmul.mubr.bf16.vlgmr.msra.gmra.mrb[52].mxu0 %v2770_v41  ;;  %v5008_v33 = vld [vmem:[%s6077_s13 + $0x18] sm:$0xff]   ;;  %v5009_v0 = vld [vmem:[%s6077_s13 + $0xe8] sm:$0xff]   ;;  %v5010_v35 = vld [vmem:[%s6077_s13 + $0x60] sm:$0xff]  }
 0x32f   : > { %v2499_v1 = vmul.f32 %v2494_v34, %v5277_v51  ;;  %2924 = vmatprep.mubr.bf16.mxu0 %v2777_v27  ;;  %4640 = vmatpush3.bf16.msra.mxu0 %v4992_v17  ;;  %v5012_v37 = vld [vmem:[%s6077_s13 + $0x20] sm:$0xff]   ;;  %v5013_v38 = vld [vmem:[%s6077_s13 + $0xf0] sm:$0xff]   ;;  %v5016_v34 = vld [vmem:[%s6077_s13 + $0x28] sm:$0xff]  }
 0x330   : > { %4757 = vmatpush3.bf16.msra.mxu1 %v4984_v39  ;;  %4641 = vmatprep.subr.bf16.mxu0 %v4993_v18  ;;  %v5014_v39 = vld [vmem:[%s6077_s13 + $0x68] sm:$0xff]   ;;  %v5015_v41 = vld [vmem:[%s6077_s13 + $0xb0] sm:$0xff]   ;;  %v5017_v27 = vld [vmem:[%s6077_s13 + $0xf8] sm:$0xff]  }
 0x331   : > { %v2500_v45 = vpack.c.bf16 %v2499_v1, %v2498_v43  ;;  %4758 = vmatprep.subr.bf16.mxu1 %v5041_v2  ;;  %v5019_v43 = vld [vmem:[%s6077_s13 + $0xb8] sm:$0xff]   ;;  %v5020_v1 = vld [vmem:[%s6077_s13 + $0x30] sm:$0xff]  }
 0x333   : > { %2502 = vst [vmem:[#allocation2 + $0x30] sm:$0xff] %v2500_v45  ;;  %2746 = vmatmul.mubr.bf16.gmra.mrb[52].mxu1 %v5800_v40  ;;  %v2524_v49 = vshll.u32 %v2500_v45, 16  ;;  %v2522_v53 = vshrl.u32 %v2500_v45, 16  ;;  %v2966_v10 = vrot.slane %v2500_v45, 1  ;;  %4642 = vmatpush3.bf16.msra.mxu0 %v4995_v20 }
 0x334   : > { %4759 = vmatpush3.bf16.msra.mxu1 %v4985_v44  ;;  %4643 = vmatprep.subr.bf16.mxu0 %v4997_v21  ;;  %v5021_v44 = vld [vmem:[%s6077_s13 + $0x78] sm:$0xff]  }
 0x335   : > { %4760 = vmatprep.subr.bf16.mxu1 %v5041_v2  ;;  %v2526_v54 = vrot.slane %v2524_v49, 1  ;;  %v2967_v11 = vsel %vm1688_vm5, %v5844_v8, %v2966_v10 }
 0x336   : > { %2925 = vmatmul.mubr.bf16.gmra.mrb[56].mxu0 %v2775_v52 }
 0x337   : > { %v2527_v55 = vor.u32 %v2526_v54, %v2522_v53  ;;  %4644 = vmatpush3.bf16.msra.mxu0 %v4999_v28 }
 0x338   : > { %4761 = vmatpush3.bf16.msra.mxu1 %v4986_v50  ;;  %4645 = vmatprep.subr.bf16.mxu0 %v5001_v23 }
 0x339   : > { %v2532_v57 = vsel %vm1427_vm4, %v2527_v55, %v2531_v48  ;;  %4762 = vmatprep.subr.bf16.mxu1 %v5041_v2 }
 0x33a   : > { %2534 = vst [vmem:[#allocation2 + $0x38] sm:$0xff] %v2532_v57  ;;  %2751 = vmatprep.mubr.bf16.mxu1 %v2532_v57  ;;  %v2541_v59 = vld [vmem:[#allocation2 + $0x30] sm:$0x7f] }
 0x33b   : > { %2752 = vmatmul.mubr.bf16.gmra.mrb[56].mxu1 %v2500_v45  ;;  %v2778_v62 = vrot.slane %v2541_v59, 7  ;;  %4646 = vmatpush3.bf16.msra.mxu0 %v5003_v24  ;;  %v5022_v45 = vld [vmem:[%s6077_s13 + $0x38] sm:$0xff]  }
 0x33c   : > { %4763 = vmatpush3.bf16.msra.mxu1 %v4987_v56  ;;  %4770 = vmatprep.mubr.msk.bf16.mxu1 %vm5042_vm0, %v5041_v2 }
 0x33d   : > { %4764 = vmatprep.subr.bf16.mxu1 %v5041_v2  ;;  %v2779_v6 = vsel %vm1026_vm2, %v5307_v31, %v2778_v62  ;;  %4647 = vmatprep.subr.bf16.mxu0 %v5005_v29 }
 0x33f   : > { %4648 = vmatpush3.bf16.msra.mxu0 %v5007_v32 }
 0x340   : > { %4765 = vmatpush3.bf16.msra.mxu1 %v4988_v58  ;;  %4649 = vmatprep.subr.bf16.mxu0 %v5009_v0 }
 0x341   : > { %v2542_v61 = vld [vmem:[#allocation2 + $0x38] sm:$0x7f]  ;;  %4766 = vmatprep.subr.bf16.mxu1 %v5041_v2 }
 0x342   : > { %v2780_v63 = vrot.slane %v2542_v61, 7 }
 0x343   : > { %4650 = vmatpush3.bf16.msra.mxu0 %v5011_v36 }
 0x344   : > { %v2781_v4 = vsel %vm1026_vm2, %v5307_v31, %v2780_v63  ;;  %4767 = vmatpush3.bf16.msra.mxu1 %v4989_v60  ;;  %v2942_v31 = vld [vmem:[#allocation2 + $0x40] sm:$0x1]  ;;  %4651 = vmatprep.subr.bf16.mxu0 %v5013_v38 }
 0x345   : > { %2930 = vmatprep.mubr.bf16.mxu0 %v2781_v4  ;;  %4768 = vmatprep.subr.bf16.mxu1 %v5041_v2  ;;  %v2968_v13 = vrot.slane %v2942_v31, 1 }
 0x346   : > { %2931 = vmatmul.mubr.bf16.gmra.mrb[60].mxu0 %v2779_v6 }
 0x347   : > { %v2969_v15 = vsel %vm1688_vm5, %v2966_v10, %v2968_v13  ;;  %4652 = vmatpush3.bf16.msra.mxu0 %v5015_v41  ;;  %v3112_v41 = vld [vmem:[#allocation2 + $0x20] sm:$0x1] }
 0x348   : > { %4769 = vmatpush3.bf16.msra.mxu1 %v4990_v5  ;;  %4653 = vmatprep.subr.bf16.mxu0 %v5017_v27 }
 0x349   : > { %4673 = vmatprep.subr.bf16.mxu1 %v4994_v19 }
 0x34b   : > { %4771 = vmatmul.mubr.bf16.vlgmr.msra.gmra.mrb[60].mxu1 %v2965_v9  ;;  %4654 = vmatpush3.bf16.msra.mxu0 %v5019_v43 }
 0x34c   : > { %4774 = vmatprep.mubr.msk.bf16.mxu1 %vm5042_vm0, %v5041_v2  ;;  %4674 = vmatpush3.bf16.msra.mxu1 %v4996_v12 }
 0x34d   : > { %4675 = vmatprep.subr.bf16.mxu1 %v4998_v22  ;;  %4782 = vmatprep.subr.bf16.mxu0 %v5041_v2 }
 0x350   : > { %4676 = vmatpush3.bf16.msra.mxu1 %v5000_v26  ;;  %v4261_v26 = vld [vmem:[%s6076_s12] ss:$0 sm:$0xff] }
 0x351   : > { %4677 = vmatprep.subr.bf16.mxu1 %v5002_v14 }
 0x353   : > { %4775 = vmatmul.mubr.bf16.gmra.mrb[64].mxu1 %v2967_v11 }
 0x354   : > { %4778 = vmatprep.mubr.msk.bf16.mxu1 %vm5042_vm0, %v5041_v2  ;;  %4678 = vmatpush3.bf16.msra.mxu1 %v5004_v25 }
 0x355   : > { %4679 = vmatprep.subr.bf16.mxu1 %v5006_v30 }
 0x358   : > { %4680 = vmatpush3.bf16.msra.mxu1 %v5008_v33 }
 0x359   : > { %4681 = vmatprep.subr.bf16.mxu1 %v5010_v35 }
 0x35b   : > { %4779 = vmatmul.mubr.bf16.gmra.mrb[68].mxu1 %v2969_v15 }
 0x35c   : > { %4682 = vmatpush3.bf16.msra.mxu1 %v5012_v37 }
 0x35d   : > { %4683 = vmatprep.subr.bf16.mxu1 %v5014_v39 }
 0x360   : > { %4684 = vmatpush3.bf16.msra.mxu1 %v5016_v34 }
 0x361   : > { %4685 = vmatprep.subr.bf16.mxu1 %v5018_v42 }
 0x364   : > { %4686 = vmatpush3.bf16.msra.mxu1 %v5020_v1 }
 0x365   : > { %4687 = vmatprep.subr.bf16.mxu1 %v5021_v44  ;;  %v3123_v44 = vshll.u32 %v3112_v41, 16 }
 0x368   : > { %4688 = vmatpush3.bf16.msra.mxu1 %v5022_v45 }
 0x3fe   : > { %v4576_v47 = vpop.f32.mrb[48].mxu1 }
 0x3ff   : > { %v4577_v49 = vpop.f32.mrb[49].mxu1 }
 0x400   : > { %v4578_v50 = vadd.f32 %v4577_v49, %v4576_v47  ;;  %v4579_v52 = vpop.f32.mrb[50].mxu1 }
 0x401   : > { %v4580_v53 = vpop.f32.mrb[51].mxu1  ;;  %v4610_v54 = vpop.f32.mrb[52].mxu0 }
 0x402   : > { %v4581_v48 = vadd.f32 %v4580_v53, %v4579_v52  ;;  %v4611_v55 = vpop.f32.mrb[53].mxu0  ;;  %v3125_v52 = vrot.slane %v3123_v44, 1  ;;  %v3144_v53 = vld [vmem:[#allocation2 + $0x8] sm:$0x80] }
 0x403   : > { %v4612_v56 = vadd.f32 %v4611_v55, %v4610_v54  ;;  %v4613_v57 = vpop.f32.mrb[54].mxu0  ;;  %v3143_v55 = vld [vmem:[#allocation2] sm:$0x80] }
 0x404   : > { %v4614_v58 = vpop.f32.mrb[55].mxu0 }
 0x405   : > { %v4615_v59 = vadd.f32 %v4614_v58, %v4613_v57  ;;  %v2919_v60 = vadd.f32 %v4612_v56, %v4578_v50 }
 0x406   : > { %v4582_v61 = vpop.f32.mrb[52].mxu1 }
 0x407   : > { %v4583_v62 = vpop.f32.mrb[53].mxu1  ;;  %v2922_v63 = vadd.f32 %v4615_v59, %v4581_v48  ;;  %v5023_v61 = vld [vmem:[%s6077_s13 + $0x100] sm:$0xff]  }
 0x408   : > { %v4585_v3 = vpop.f32.mrb[54].mxu1  ;;  %v3379_v62 = vrot.slane %v3144_v53, 7 }
 0x409   : > { %v4616_v4 = vpop.f32.mrb[56].mxu0  ;;  %v4586_v5 = vpop.f32.mrb[55].mxu1 }
 0x40a   : > { %v4617_v6 = vpop.f32.mrb[57].mxu0  ;;  %v3376_v4 = vrot.slane %v3143_v55, 7 }
 0x40b   : > { %v4619_v7 = vpop.f32.mrb[58].mxu0 }
 0x40c   : > { %v4620_v9 = vpop.f32.mrb[59].mxu0 }
 0x40d   : > { %v3384_v9 = vrot.slane %v5800_v40, 7 }
 0x40e   : > { %v4588_v10 = vpop.f32.mrb[56].mxu1 }
 0x40f   : > { %v4589_v11 = vpop.f32.mrb[57].mxu1 }
 0x410   : > { %v4590_v31 = vadd.f32 %v4589_v11, %v4588_v10  ;;  %v4591_v13 = vpop.f32.mrb[58].mxu1 }
 0x411   : > { %v4592_v15 = vpop.f32.mrb[59].mxu1 }
 0x412   : > { %v4593_v16 = vadd.f32 %v4592_v15, %v4591_v13  ;;  %v5024_v13 = vld [vmem:[%s6077_s13 + $0x108] sm:$0xff]  }
 0x419   : > { %v4622_v17 = vpop.f32.mrb[60].mxu0 }
 0x41a   : > { %v4623_v18 = vpop.f32.mrb[61].mxu0 }
 0x41b   : > { %v4624_v19 = vadd.f32 %v4623_v18, %v4622_v17  ;;  %v4625_v20 = vpop.f32.mrb[62].mxu0  ;;  %v3114_v18 = vld [vmem:[#allocation2 + $0x40] sm:$0x1] }
 0x41c   : > { %v4626_v12 = vpop.f32.mrb[63].mxu0 }
 0x41d   : > { %v4627_v21 = vadd.f32 %v4626_v12, %v4625_v20  ;;  %v2933_v22 = vadd.f32 %v4624_v19, %v4590_v31  ;;  %v5025_v12 = vld [vmem:[%s6077_s13 + $0x110] sm:$0xff]  }
 0x41e   : > { %v3055_v28 = vpop.f32.mrb[60].mxu1 }
 0x41f   : > { %v3076_v23 = vadd.f32 %v3055_v28, %v2919_v60  ;;  %v4772_v14 = vpop.f32.mrb[61].mxu1  ;;  %v2936_v24 = vadd.f32 %v4627_v21, %v4593_v16 }
 0x420   : > { %v3058_v25 = vpop.f32.mrb[62].mxu1 }
 0x421   : > { %v3087_v29 = vadd.f32 %v4261_v26, %v3076_v23  ;;  %v3077_v30 = vadd.f32 %v3058_v25, %v2922_v63  ;;  %v4773_v32 = vpop.f32.mrb[63].mxu1 }
 0x423   : > { %vm3091_vm14 = vcmp.gt.f32.partialorder %v3087_v29, 0.0  ;;  %v3095_v33 = vmul.f32 0.1, %v3087_v29  ;;  %v3088_v0 = vadd.f32 %v4261_v26, %v3077_v30  ;;  %v5027_v30 = vld [vmem:[%s6077_s13 + $0x120] sm:$0xff]  }
 0x425   : > { %v3099_v35 = vsel %vm3091_vm14, %v3087_v29, %v3095_v33  ;;  %vm3092_vm15 = vcmp.gt.f32.partialorder %v3088_v0, 0.0  ;;  %v3096_v36 = vmul.f32 0.1, %v3088_v0  ;;  %v5028_v33 = vld [vmem:[%s6077_s13 + $0x128] sm:$0xff]  }
 0x426   : > { %v3063_v37 = vpop.f32.mrb[64].mxu1  ;;  %v3103_v34 = vmul.f32 %v3099_v35, %v5275_v46  ;;  %v5029_v35 = vld [vmem:[%s6077_s13 + $0x130] sm:$0xff]  }
 0x427   : > { %v3100_v38 = vsel %vm3092_vm15, %v3088_v0, %v3096_v36  ;;  %v4776_v39 = vpop.f32.mrb[65].mxu1 }
 0x428   : > { %v3104_v27 = vmul.f32 %v3100_v38, %v5277_v51  ;;  %v3065_v42 = vpop.f32.mrb[66].mxu1 }
 0x429   : > { %v4777_v43 = vpop.f32.mrb[67].mxu1 }
 0x42a   : > { %v3105_v1 = vpack.c.bf16 %v3104_v27, %v3103_v34  ;;  %v5030_v34 = vld [vmem:[%s6077_s13 + $0x138] sm:$0xff]  }
 0x42c   : > { %3109 = vst [vmem:[#allocation2 + $0x10] sm:$0xff] %v3105_v1  ;;  %v3118_v45 = vshll.u32 %v3105_v1, 16  ;;  %v3116_v49 = vshrl.u32 %v3105_v1, 16  ;;  %v3377_v3 = vrot.slane %v3105_v1, 7 }
 0x42e   : > { %v3069_v47 = vpop.f32.mrb[68].mxu1  ;;  %v3120_v50 = vrot.slane %v3118_v45, 1  ;;  %v3378_v15 = vsel %vm1026_vm2, %v3376_v4, %v3377_v3  ;;  %v3383_v23 = vsel %vm1026_vm2, %v3377_v3, %v3384_v9  ;;  %v3550_v45 = vld [vmem:[#allocation2 + $0x40] sm:$0x1] }
 0x42f   : > { %v3078_v54 = vadd.f32 %v3069_v47, %v2933_v22  ;;  %v4780_v48 = vpop.f32.mrb[69].mxu1  ;;  %v3137_v22 = vshll.u32 %v3114_v18, 16  ;;  %v3576_v47 = vrot.slane %v3550_v45, 1 }
 0x430   : > { %v3072_v56 = vpop.f32.mrb[70].mxu1  ;;  %v3121_v57 = vor.u32 %v3120_v50, %v3116_v49 }
 0x431   : > { %v3089_v58 = vadd.f32 %v4261_v26, %v3078_v54  ;;  %v3079_v59 = vadd.f32 %v3072_v56, %v2936_v24  ;;  %v4781_v60 = vpop.f32.mrb[71].mxu1  ;;  %v3139_v25 = vrot.slane %v3137_v22, 1 }
 0x432   : > { %v3126_v63 = vsel %vm1427_vm4, %v3121_v57, %v3125_v52 }
 0x433   : > { %vm3093_vm1 = vcmp.gt.f32.partialorder %v3089_v58, 0.0  ;;  %v3097_v5 = vmul.f32 0.1, %v3089_v58  ;;  %v3090_v6 = vadd.f32 %v4261_v26, %v3079_v59  ;;  %3128 = vst [vmem:[#allocation2 + $0x18] sm:$0xff] %v3126_v63  ;;  %3345 = vmatprep.mubr.bf16.mxu0 %v3126_v63  ;;  %v3380_v7 = vrot.slane %v3126_v63, 7  ;;  %v5026_v26 = vld [vmem:[%s6077_s13 + $0x118] sm:$0xff]  }
 0x434   : > { %3346 = vmatmul.mubr.bf16.vlgmr.msra.gmra.mrb[64].mxu0 %v3105_v1  ;;  %v3547_v39 = vld [vmem:[#allocation2 + $0x10] sm:$0xfe] }
 0x435   : > { %v3101_v10 = vsel %vm3093_vm1, %v3089_v58, %v3097_v5  ;;  %vm3094_vm3 = vcmp.gt.f32.partialorder %v3090_v6, 0.0  ;;  %v3098_v11 = vmul.f32 0.1, %v3090_v6  ;;  %4783 = vmatpush3.bf16.msra.mxu0 %v5023_v61  ;;  %v3381_v31 = vsel %vm1026_vm2, %v3379_v62, %v3380_v7  ;;  %3353 = vmatprep.mubr.bf16.mxu0 %v5800_v40 }
 0x436   : > { %3524 = vmatprep.mubr.bf16.mxu1 %v3381_v31  ;;  %4784 = vmatprep.subr.bf16.mxu0 %v5041_v2  ;;  %v3385_v17 = vsel %vm1026_vm2, %v3380_v7, %v3384_v9  ;;  %v3106_v19 = vmul.f32 %v3101_v10, %v5275_v46  ;;  %v3571_v42 = vrot.slane %v3547_v39, 1 }
 0x437   : > { %v3102_v16 = vsel %vm3094_vm3, %v3090_v6, %v3098_v11  ;;  %3525 = vmatmul.mubr.bf16.vlgmr.msra.gmra.mrb[72].mxu1 %v3378_v15 }
 0x438   : > { %v3107_v20 = vmul.f32 %v3102_v16, %v5277_v51  ;;  %3532 = vmatprep.mubr.bf16.mxu1 %v3385_v17  ;;  %v3573_v43 = vsel %vm1688_vm5, %v3571_v42, %v5844_v8 }
 0x439   : > { %4785 = vmatpush3.bf16.msra.mxu0 %v5024_v13 }
 0x43a   : > { %v3108_v21 = vpack.c.bf16 %v3107_v20, %v3106_v19  ;;  %4786 = vmatprep.subr.bf16.mxu0 %v5041_v2 }
 0x43c   : > { %3110 = vst [vmem:[#allocation2 + $0x30] sm:$0xff] %v3108_v21  ;;  %3354 = vmatmul.mubr.bf16.gmra.mrb[68].mxu0 %v5800_v40  ;;  %v3132_v28 = vshll.u32 %v3108_v21, 16  ;;  %v3130_v14 = vshrl.u32 %v3108_v21, 16  ;;  %v3574_v1 = vrot.slane %v3108_v21, 1 }
 0x43d   : > { %4787 = vmatpush3.bf16.msra.mxu0 %v5025_v12 }
 0x43e   : > { %4788 = vmatprep.subr.bf16.mxu0 %v5041_v2  ;;  %v3134_v24 = vrot.slane %v3132_v28, 1  ;;  %v3575_v44 = vsel %vm1688_vm5, %v5844_v8, %v3574_v1  ;;  %v3577_v49 = vsel %vm1688_vm5, %v3574_v1, %v3576_v47 }
 0x43f   : > { %3533 = vmatmul.mubr.bf16.gmra.mrb[76].mxu1 %v3383_v23 }
 0x440   : > { %v3135_v29 = vor.u32 %v3134_v24, %v3130_v14 }
 0x441   : > { %4789 = vmatpush3.bf16.msra.mxu0 %v5026_v26  ;;  %v4302_v26 = vld [vmem:[%s6078_s14] ss:$0 sm:$0xff] }
 0x442   : > { %v3140_v32 = vsel %vm1427_vm4, %v3135_v29, %v3139_v25  ;;  %4790 = vmatprep.subr.bf16.mxu0 %v5041_v2 }
 0x443   : > { %3142 = vst [vmem:[#allocation2 + $0x38] sm:$0xff] %v3140_v32  ;;  %3359 = vmatprep.mubr.bf16.mxu0 %v3140_v32  ;;  %v3149_v0 = vld [vmem:[#allocation2 + $0x30] sm:$0x7f] }
 0x444   : > { %3360 = vmatmul.mubr.bf16.gmra.mrb[72].mxu0 %v3108_v21  ;;  %v3386_v37 = vrot.slane %v3149_v0, 7 }
 0x445   : > { %4791 = vmatpush3.bf16.msra.mxu0 %v5027_v30  ;;  %4798 = vmatprep.mubr.msk.bf16.mxu0 %vm5042_vm0, %v5041_v2 }
 0x446   : > { %4792 = vmatprep.subr.bf16.mxu0 %v5041_v2  ;;  %v3387_v27 = vsel %vm1026_vm2, %v3384_v9, %v3386_v37 }
 0x449   : > { %4793 = vmatpush3.bf16.msra.mxu0 %v5028_v33  ;;  %v4303_v33 = vld [vmem:[%s6079_s15] ss:$0 sm:$0xff] }
 0x44a   : > { %v3150_v36 = vld [vmem:[#allocation2 + $0x38] sm:$0x7f]  ;;  %4794 = vmatprep.subr.bf16.mxu0 %v5041_v2 }
 0x44b   : > { %v3388_v38 = vrot.slane %v3150_v36, 7  ;;  %v3718_v36 = vmul.f32 %v4303_v33, %v5275_v46 }
 0x44d   : > { %v3389_v41 = vsel %vm1026_vm2, %v3384_v9, %v3388_v38  ;;  %4795 = vmatpush3.bf16.msra.mxu0 %v5029_v35 }
 0x44e   : > { %3538 = vmatprep.mubr.bf16.mxu1 %v3389_v41  ;;  %4796 = vmatprep.subr.bf16.mxu0 %v5041_v2 }
 0x44f   : > { %3539 = vmatmul.mubr.bf16.gmra.mrb[80].mxu1 %v3387_v27 }
 0x451   : > { %4797 = vmatpush3.bf16.msra.mxu0 %v5030_v34 }
 0x454   : > { %4799 = vmatmul.mubr.bf16.vlgmr.msra.gmra.mrb[76].mxu0 %v3573_v43  ;;  %v3719_v43 = vmul.f32 %v4303_v33, %v5277_v51 }
 0x455   : > { %4802 = vmatprep.mubr.msk.bf16.mxu0 %vm5042_vm0, %v5041_v2 }
 0x45c   : > { %4803 = vmatmul.mubr.bf16.gmra.mrb[80].mxu0 %v3575_v44 }
 0x45d   : > { %4806 = vmatprep.mubr.msk.bf16.mxu0 %vm5042_vm0, %v5041_v2 }
 0x464   : > { %4807 = vmatmul.mubr.bf16.gmra.mrb[84].mxu0 %v3577_v49 }
 0x507   : > { %v4655_v50 = vpop.f32.mrb[64].mxu0 }
 0x508   : > { %v4656_v52 = vpop.f32.mrb[65].mxu0 }
 0x509   : > { %v4657_v53 = vadd.f32 %v4656_v52, %v4655_v50  ;;  %v4658_v54 = vpop.f32.mrb[66].mxu0 }
 0x50a   : > { %v4659_v48 = vpop.f32.mrb[67].mxu0  ;;  %v4689_v55 = vpop.f32.mrb[72].mxu1 }
 0x50b   : > { %v4660_v56 = vadd.f32 %v4659_v48, %v4658_v54  ;;  %v4690_v57 = vpop.f32.mrb[73].mxu1 }
 0x50c   : > { %v4691_v58 = vadd.f32 %v4690_v57, %v4689_v55  ;;  %v4692_v59 = vpop.f32.mrb[74].mxu1 }
 0x50d   : > { %v4693_v8 = vpop.f32.mrb[75].mxu1 }
 0x50e   : > { %v4694_v60 = vadd.f32 %v4693_v8, %v4692_v59  ;;  %v3527_v61 = vadd.f32 %v4691_v58, %v4657_v53  ;;  %v3720_v59 = vld [vmem:[#allocation3] sm:$0x1] }
 0x50f   : > { %v4661_v62 = vpop.f32.mrb[68].mxu0 }
 0x510   : > { %v4662_v63 = vpop.f32.mrb[69].mxu0  ;;  %v3530_v2 = vadd.f32 %v4694_v60, %v4660_v56 }
 0x511   : > { %v4664_v3 = vpop.f32.mrb[70].mxu0 }
 0x512   : > { %v4695_v4 = vpop.f32.mrb[76].mxu1  ;;  %v4665_v5 = vpop.f32.mrb[71].mxu0 }
 0x513   : > { %v4696_v6 = vpop.f32.mrb[77].mxu1 }
 0x514   : > { %v4698_v7 = vpop.f32.mrb[78].mxu1 }
 0x515   : > { %v4699_v9 = vpop.f32.mrb[79].mxu1 }
 0x517   : > { %v4667_v10 = vpop.f32.mrb[72].mxu0 }
 0x518   : > { %v4668_v11 = vpop.f32.mrb[73].mxu0 }
 0x519   : > { %v4669_v31 = vadd.f32 %v4668_v11, %v4667_v10  ;;  %v4670_v13 = vpop.f32.mrb[74].mxu0 }
 0x51a   : > { %v4671_v15 = vpop.f32.mrb[75].mxu0 }
 0x51b   : > { %v4672_v16 = vadd.f32 %v4671_v15, %v4670_v13 }
 0x522   : > { %v4701_v17 = vpop.f32.mrb[80].mxu1 }
 0x523   : > { %v4702_v18 = vpop.f32.mrb[81].mxu1 }
 0x524   : > { %v4703_v19 = vadd.f32 %v4702_v18, %v4701_v17  ;;  %v4704_v20 = vpop.f32.mrb[82].mxu1 }
 0x525   : > { %v4705_v12 = vpop.f32.mrb[83].mxu1 }
 0x526   : > { %v4706_v21 = vadd.f32 %v4705_v12, %v4704_v20  ;;  %v3541_v22 = vadd.f32 %v4703_v19, %v4669_v31 }
 0x527   : > { %v3663_v28 = vpop.f32.mrb[76].mxu0 }
 0x528   : > { %v3684_v23 = vadd.f32 %v3663_v28, %v3527_v61  ;;  %v4800_v14 = vpop.f32.mrb[77].mxu0  ;;  %v3544_v24 = vadd.f32 %v4706_v21, %v4672_v16 }
 0x529   : > { %v3666_v25 = vpop.f32.mrb[78].mxu0 }
 0x52a   : > { %v3695_v29 = vadd.f32 %v4302_v26, %v3684_v23  ;;  %v3685_v30 = vadd.f32 %v3666_v25, %v3530_v2  ;;  %v4801_v32 = vpop.f32.mrb[79].mxu0 }
 0x52c   : > { %vm3699_vm0 = vcmp.gt.f32.partialorder %v3695_v29, 0.0  ;;  %v3703_v0 = vmul.f32 0.1, %v3695_v29  ;;  %v3696_v35 = vadd.f32 %v4302_v26, %v3685_v30 }
 0x52e   : > { %vm3700_vm2 = vcmp.gt.f32.partialorder %v3696_v35, 0.0  ;;  %v3704_v37 = vmul.f32 0.1, %v3696_v35  ;;  %v3707_v38 = vsel %vm3699_vm0, %v3695_v29, %v3703_v0 }
 0x52f   : > { %v3671_v39 = vpop.f32.mrb[80].mxu0  ;;  %v3721_v41 = vmul.f32 %v3718_v36, %v3707_v38 }
 0x530   : > { %v3708_v34 = vsel %vm3700_vm2, %v3696_v35, %v3704_v37  ;;  %v4804_v27 = vpop.f32.mrb[81].mxu0 }
 0x531   : > { %v3673_v42 = vpop.f32.mrb[82].mxu0  ;;  %3723 = vxpose.xlu1.b32.start [1/2] (short) %v3721_v41, 128  ;;  %v3722_v44 = vmul.f32 %v3719_v43, %v3708_v34 }
 0x532   : > { %v4805_v1 = vpop.f32.mrb[83].mxu0 }
 0x535   : > { %3724 = vxpose.xlu1.b32.end [2/2] (short) %v3722_v44, 128 }
 0x537   : > { %v3677_v45 = vpop.f32.mrb[84].mxu0 }
 0x538   : > { %v3686_v47 = vadd.f32 %v3677_v45, %v3541_v22  ;;  %v4808_v49 = vpop.f32.mrb[85].mxu0 }
 0x539   : > { %v3680_v50 = vpop.f32.mrb[86].mxu0 }
 0x53a   : > { %v3697_v52 = vadd.f32 %v4302_v26, %v3686_v47  ;;  %v3687_v46 = vadd.f32 %v3680_v50, %v3544_v24  ;;  %v4809_v53 = vpop.f32.mrb[87].mxu0 }
 0x53c   : > { %vm3701_vm4 = vcmp.gt.f32.partialorder %v3697_v52, 0.0  ;;  %v3705_v54 = vmul.f32 0.1, %v3697_v52  ;;  %v3698_v48 = vadd.f32 %v4302_v26, %v3687_v46 }
 0x53e   : > { %vm3702_vm5 = vcmp.gt.f32.partialorder %v3698_v48, 0.0  ;;  %v3706_v55 = vmul.f32 0.1, %v3698_v48  ;;  %v3709_v56 = vsel %vm3701_vm4, %v3697_v52, %v3705_v54 }
 0x53f   : > { %v3793_v57 = vmul.f32 %v3718_v36, %v3709_v56 }
 0x540   : > { %v3710_v58 = vsel %vm3702_vm5, %v3698_v48, %v3706_v55 }
 0x541   : > { %3795 = vxpose.xlu0.b32.start [1/2] (short) %v3793_v57, 128  ;;  %v3794_v51 = vmul.f32 %v3719_v43, %v3710_v58 }
 0x545   : > { %3796 = vxpose.xlu0.b32.end [2/2] (short) %v3794_v51, 128 }
 0x56e   : > { %4827 = vset.pattern.permute.xlu0 %v5800_v40 }
 0x5a6   : > { %3866 = vperm.xlu0 %4827, %v3720_v59  }
 0x5b1   : > { %v3739_v8 = vpop.trf.xlu1 }
 0x5b2   : > { %v3756_v10 = vsel %vm3755_vm6, %v3739_v8, 0.0 }
 0x5b5   : > { %v3740_v60 = vpop.trf.xlu1 }
 0x5b6   : > { %v3757_v11 = vsel %vm3755_vm6, %v3740_v60, 0.0 }
 0x5b7   : > { %v3758_v31 = vadd.f32 %v3757_v11, %v3756_v10 }
 0x5b9   : > { %v3741_v61 = vpop.trf.xlu1 }
 0x5ba   : > { %v3759_v13 = vsel %vm3755_vm6, %v3741_v61, 0.0 }
 0x5bb   : > { %v3760_v19 = vadd.f32 %v3759_v13, %v3758_v31 }
 0x5bd   : > { %v3742_v62 = vpop.trf.xlu1 }
 0x5be   : > { %v3761_v12 = vsel %vm3755_vm6, %v3742_v62, 0.0 }
 0x5bf   : > { %v3762_v28 = vadd.f32 %v3761_v12, %v3760_v19 }
 0x5c1   : > { %v3811_v63 = vpop.trf.xlu0  ;;  %v3743_v3 = vpop.trf.xlu1 }
 0x5c2   : > { %v3827_v15 = vsel %vm3755_vm6, %v3811_v63, 0.0  ;;  %v3763_v14 = vsel %vm3755_vm6, %v3743_v3, 0.0 }
 0x5c3   : > { %v3764_v29 = vadd.f32 %v3763_v14, %v3762_v28 }
 0x5c5   : > { %v3812_v2 = vpop.trf.xlu0  ;;  %v3744_v5 = vpop.trf.xlu1 }
 0x5c6   : > { %v3828_v16 = vsel %vm3755_vm6, %v3812_v2, 0.0  ;;  %v3765_v32 = vsel %vm3755_vm6, %v3744_v5, 0.0 }
 0x5c7   : > { %v3829_v20 = vadd.f32 %v3828_v16, %v3827_v15  ;;  %v3766_v36 = vadd.f32 %v3765_v32, %v3764_v29 }
 0x5c9   : > { %v3813_v4 = vpop.trf.xlu0  ;;  %v3745_v9 = vpop.trf.xlu1 }
 0x5ca   : > { %v3830_v21 = vsel %vm3755_vm6, %v3813_v4, 0.0  ;;  %v3767_v38 = vsel %vm3755_vm6, %v3745_v9, 0.0 }
 0x5cb   : > { %v3831_v26 = vadd.f32 %v3830_v21, %v3829_v20  ;;  %v3768_v41 = vadd.f32 %v3767_v38, %v3766_v36 }
 0x5cd   : > { %v3814_v6 = vpop.trf.xlu0  ;;  %v3746_v17 = vpop.trf.xlu1 }
 0x5ce   : > { %v3832_v24 = vsel %vm3755_vm6, %v3814_v6, 0.0  ;;  %v3769_v43 = vsel %vm3755_vm6, %v3746_v17, 0.0 }
 0x5cf   : > { %v3833_v30 = vadd.f32 %v3832_v24, %v3831_v26  ;;  %v3770_v44 = vadd.f32 %v3769_v43, %v3768_v41 }
 0x5d1   : > { %v3815_v7 = vpop.trf.xlu0  ;;  %v3747_v23 = vpop.trf.xlu1 }
 0x5d2   : > { %v3834_v33 = vsel %vm3755_vm6, %v3815_v7, 0.0  ;;  %v3771_v47 = vsel %vm3755_vm6, %v3747_v23, 0.0 }
 0x5d3   : > { %v3835_v37 = vadd.f32 %v3834_v33, %v3833_v30  ;;  %v3772_v46 = vadd.f32 %v3771_v47, %v3770_v44 }
 0x5d5   : > { %v3816_v40 = vpop.trf.xlu0  ;;  %v3748_v0 = vpop.trf.xlu1 }
 0x5d6   : > { %v3836_v39 = vsel %vm3755_vm6, %v3816_v40, 0.0  ;;  %v3773_v54 = vsel %vm3755_vm6, %v3748_v0, 0.0  ;;  %v3869_v0 = vlaneseq }
 0x5d7   : > { %v3837_v34 = vadd.f32 %v3836_v39, %v3835_v37  ;;  %v3774_v55 = vadd.f32 %v3773_v54, %v3772_v46 }
 0x5d8   : > { %v3870_v37 = vshrl.u32 %v3869_v0, 7 }
 0x5d9   : > { %v3817_v18 = vpop.trf.xlu0  ;;  %v3749_v27 = vpop.trf.xlu1 }
 0x5da   : > { %v3838_v1 = vsel %vm3755_vm6, %v3817_v18, 0.0  ;;  %v3775_v51 = vsel %vm3755_vm6, %v3749_v27, 0.0  ;;  %v3871_v39 = vsub.s32 0, %v3870_v37 }
 0x5db   : > { %v3839_v45 = vadd.f32 %v3838_v1, %v3837_v34  ;;  %v3776_v8 = vadd.f32 %v3775_v51, %v3774_v55  ;;  %v598_v1 = vld [vmem:[%s578_s24] sm:$0x1] }
 0x5dd   : > { %v3818_v22 = vpop.trf.xlu0  ;;  %v3750_v50 = vpop.trf.xlu1 }
 0x5de   : > { %v3840_v49 = vsel %vm3755_vm6, %v3818_v22, 0.0  ;;  %v3777_v61 = vsel %vm3755_vm6, %v3750_v50, 0.0 }
 0x5df   : > { %v3841_v53 = vadd.f32 %v3840_v49, %v3839_v45  ;;  %v3778_v3 = vadd.f32 %v3777_v61, %v3776_v8 }
 0x5e1   : > { %v3819_v25 = vpop.trf.xlu0  ;;  %v3751_v57 = vpop.trf.xlu1 }
 0x5e2   : > { %v3842_v48 = vsel %vm3755_vm6, %v3819_v25, 0.0  ;;  %v3779_v5 = vsel %vm3755_vm6, %v3751_v57, 0.0 }
 0x5e3   : > { %v3843_v56 = vadd.f32 %v3842_v48, %v3841_v53  ;;  %v3780_v7 = vadd.f32 %v3779_v5, %v3778_v3 }
 0x5e5   : > { %v3820_v35 = vpop.trf.xlu0  ;;  %v3752_v63 = vpop.trf.xlu1 }
 0x5e6   : > { %v3844_v59 = vsel %vm3755_vm6, %v3820_v35, 0.0  ;;  %v3781_v40 = vsel %vm3755_vm6, %v3752_v63, 0.0 }
 0x5e7   : > { %v3845_v60 = vadd.f32 %v3844_v59, %v3843_v56  ;;  %v3782_v13 = vadd.f32 %v3781_v40, %v3780_v7 }
 0x5e9   : > { %v3821_v42 = vpop.trf.xlu0  ;;  %v3753_v10 = vpop.trf.xlu1 }
 0x5ea   : > { %v3846_v62 = vsel %vm3755_vm6, %v3821_v42, 0.0  ;;  %v3783_v16 = vsel %vm3755_vm6, %v3753_v10, 0.0 }
 0x5eb   : > { %v3847_v4 = vadd.f32 %v3846_v62, %v3845_v60  ;;  %v3784_v12 = vadd.f32 %v3783_v16, %v3782_v13 }
 0x5ed   : > { %v3822_v52 = vpop.trf.xlu0  ;;  %v3754_v18 = vpop.trf.xlu1 }
 0x5ee   : > { %v3848_v6 = vsel %vm3755_vm6, %v3822_v52, 0.0  ;;  %v3785_v22 = vsel %vm3755_vm6, %v3754_v18, 0.0 }
 0x5ef   : > { %v3849_v9 = vadd.f32 %v3848_v6, %v3847_v4  ;;  %v3786_v23 = vadd.f32 %v3785_v22, %v3784_v12 }
 0x5f1   : > { %v3823_v58 = vpop.trf.xlu0  ;;  %v3787_v24 = vrot.slane %v3786_v23, 4 }
 0x5f2   : > { %v3850_v31 = vsel %vm3755_vm6, %v3823_v58, 0.0 }
 0x5f3   : > { %v3851_v15 = vadd.f32 %v3850_v31, %v3849_v9  ;;  %v3788_v29 = vadd.f32 %v3787_v24, %v3786_v23 }
 0x5f5   : > { %v3824_v2 = vpop.trf.xlu0  ;;  %v3789_v32 = vrot.slane %v3788_v29, 2 }
 0x5f6   : > { %v3852_v17 = vsel %vm3755_vm6, %v3824_v2, 0.0 }
 0x5f7   : > { %v3853_v21 = vadd.f32 %v3852_v17, %v3851_v15  ;;  %v3790_v35 = vadd.f32 %v3789_v32, %v3788_v29 }
 0x5f9   : > { %v3825_v11 = vpop.trf.xlu0  ;;  %v3791_v41 = vrot.slane %v3790_v35, 1 }
 0x5fa   : > { %v3854_v20 = vsel %vm3755_vm6, %v3825_v11, 0.0 }
 0x5fb   : > { %v3855_v26 = vadd.f32 %v3854_v20, %v3853_v21  ;;  %v3792_v42 = vadd.f32 %v3791_v41, %v3790_v35 }
 0x5fd   : > { %v3826_v19 = vpop.trf.xlu0 }
 0x5fe   : > { %v3856_v28 = vsel %vm3755_vm6, %v3826_v19, 0.0 }
 0x5ff   : > { %v3857_v14 = vadd.f32 %v3856_v28, %v3855_v26 }
 0x601   : > { %v3858_v25 = vrot.slane %v3857_v14, 4 }
 0x603   : > { %v3859_v30 = vadd.f32 %v3858_v25, %v3857_v14 }
 0x605   : > { %v3860_v33 = vrot.slane %v3859_v30, 2 }
 0x607   : > { %v3861_v36 = vadd.f32 %v3860_v33, %v3859_v30 }
 0x609   : > { %v3862_v38 = vrot.slane %v3861_v36, 1 }
 0x60b   : > { %v3863_v27 = vadd.f32 %v3862_v38, %v3861_v36 }
 0x625   : > { %v3867_v34 = vpop.permute.xlu0 %3866 }
 0x626   : > { %v3872_v43 = vrot.slane %v3867_v34, %v3871_v39 }
 0x628   : > { %v3873_v44 = vadd.f32 %v3872_v43, %v3792_v42  ;;  %v3877_v45 = vadd.f32 %v3872_v43, %v3863_v27 }
 0x62a   : > { %v3874_v47 = vmul.f32 %v3873_v44, %v598_v1  ;;  %v3878_v49 = vmul.f32 %v3877_v45, %v598_v1 }
 0x62c   : > { %3876 = vst.msk [vmem:[%s582_s16] sm:$0x1] %vm3875_vm7, %v3874_v47  ;;  %3879 = vst.msk [vmem:[%s582_s16 + $0x1] sm:$0x1] %vm3875_vm7, %v3878_v49 }
 0x62d PF: > { %s29_s26 = sadd.s32 1, %s5039_s26  }
 0x62e   : > { %p26_p4 = scmp.ge.s32.totalorder %s29_s26, 4  }
 0x630   :  { %28 = sbr.rel (!%p26_p4) target bundleno = 3 (0x3), region = 128 }

</bundles_post_ra>
